<compile_context>
chip_gen: v7x
topology: tpu7x:2x2x1
jax: 0.10.0
libtpu: 0.0.40
codegen_flags: <defaults>
</compile_context>

<pallas_src>
import numpy as np
import jax
import jax.numpy as jnp
from jax import lax
from jax.experimental import pallas as pl
from jax.experimental.pallas import tpu as pltpu

EPS = 1e-5
NEG_SLOPE = 0.2

# tap order t = (dy+1)*3 + (dx+1), dy/dx in {-1,0,1}
_TAPS = [(dy, dx) for dy in (-1, 0, 1) for dx in (-1, 0, 1)]


def _make_fused_kernel(N, C, H, W):
    P = N * H * W
    offsets = [dy * W + dx for (dy, dx) in _TAPS]

    def shift_lanes(x, off):
        # xs[:, p] = x[:, (p + off) % P]; lanes that wrap are zeroed by the mask.
        s = (-off) % P
        if s == 0:
            return x
        return pltpu.roll(x, s, axis=1)

    def conv3x3(x, w_ref, masks):
        # 9 shifted (C,C)@(C,P) matmuls accumulated in f32 (no im2col buffer).
        acc = jnp.zeros((C, P), jnp.float32)
        for t in range(9):
            xs = shift_lanes(x, offsets[t]) * masks[t]          # (C,P) * (1,P)
            acc = acc + jnp.dot(w_ref[t], xs,
                                preferred_element_type=jnp.float32)
        return acc

    def bn_lrelu(y, gamma, beta):
        # training-mode BN: one-pass batch stats (biased variance), then affine.
        inv_p = jnp.float32(1.0 / P)
        mean = jnp.sum(y, axis=1, keepdims=True) * inv_p                 # (C,1)
        var = jnp.sum(y * y, axis=1, keepdims=True) * inv_p - mean * mean
        y = (y - mean) * lax.rsqrt(var + EPS) * gamma + beta
        return jnp.where(y >= 0, y, NEG_SLOPE * y)                       # LeakyReLU

    def kernel(x_ref, masks_ref, w1_ref, g1_ref, b1_ref,
               w2_ref, g2_ref, b2_ref, out_ref):
        x = x_ref[...]                                    # (C, P) lane-dense
        m_all = masks_ref[...]                            # (9, P)
        masks = [m_all[t:t + 1, :] for t in range(9)]     # static slices -> (1,P)

        y = conv3x3(x, w1_ref, masks)                     # conv bias dropped (BN cancels it)
        y = bn_lrelu(y, g1_ref[...], b1_ref[...])
        y = conv3x3(y, w2_ref, masks)                     # y1 stays resident in VMEM
        y = bn_lrelu(y, g2_ref[...], b2_ref[...])
        out_ref[...] = x + y                              # residual add, dense store

    return kernel


def _build_masks(N, H, W):
    """(9, N*H*W) f32 validity masks for the 9 taps (zero padding), compile-time."""
    h = np.arange(H).reshape(H, 1)
    w = np.arange(W).reshape(1, W)
    ms = []
    for dy, dx in _TAPS:
        valid = ((h + dy >= 0) & (h + dy < H) & (w + dx >= 0) & (w + dx < W))
        ms.append(np.broadcast_to(valid, (H, W)))
    m = np.stack(ms, 0).astype(np.float32)                       # (9, H, W)
    m = np.broadcast_to(m[:, None, :, :], (9, N, H, W)).reshape(9, N * H * W)
    return jnp.asarray(m)


def gen_residual_block(x_nchw, params):
    """Pallas implementation of GenResidualBlock.forward (in_channels == out_channels)."""
    N, C, H, W = x_nchw.shape
    P = N * H * W

    # lane-dense layout: channels on sublanes, pixels (N*H*W) on lanes.
    x_cp = jnp.transpose(x_nchw, (1, 0, 2, 3)).reshape(C, P).astype(jnp.float32)

    # PyTorch conv weight (Cout, Cin, 3, 3) -> (9, Cout, Cin), tap-major (ky, kx).
    w1 = jnp.transpose(params["w1"], (2, 3, 0, 1)).reshape(9, C, C).astype(jnp.float32)
    w2 = jnp.transpose(params["w2"], (2, 3, 0, 1)).reshape(9, C, C).astype(jnp.float32)
    g1 = params["g1"].reshape(C, 1).astype(jnp.float32)
    be1 = params["be1"].reshape(C, 1).astype(jnp.float32)
    g2 = params["g2"].reshape(C, 1).astype(jnp.float32)
    be2 = params["be2"].reshape(C, 1).astype(jnp.float32)

    masks = _build_masks(N, H, W)

    vmem = pl.BlockSpec(memory_space=pltpu.MemorySpace.VMEM)
    flops = 2 * (2 * 9 * C * C * P) + 2 * (12 * C * P)           # 2 convs + BN/LReLU/res
    bytes_accessed = 4 * (2 * C * P + 9 * P + 2 * 9 * C * C + 4 * C)

    out_cp = pl.pallas_call(
        _make_fused_kernel(N, C, H, W),
        out_shape=jax.ShapeDtypeStruct((C, P), jnp.float32),
        in_specs=[vmem] * 8,
        out_specs=vmem,
        compiler_params=pltpu.CompilerParams(vmem_limit_bytes=32 * 1024 * 1024),
        cost_estimate=pl.CostEstimate(flops=int(flops), transcendentals=2 * C,
                                      bytes_accessed=int(bytes_accessed)),
    )(x_cp, masks, w1, g1, be1, w2, g2, be2)

    return jnp.transpose(out_cp.reshape(C, N, H, W), (1, 0, 2, 3))   # back to NCHW


# ---------------- pure-JAX reference (for correctness check) ----------------
def _bn_train_ref(y, gamma, beta):
    mean = jnp.mean(y, axis=(0, 2, 3), keepdims=True)
    var = jnp.mean((y - mean) ** 2, axis=(0, 2, 3), keepdims=True)
    return ((y - mean) * lax.rsqrt(var + EPS) * gamma[None, :, None, None]
            + beta[None, :, None, None])


def _leaky_ref(y):
    return jnp.where(y >= 0, y, NEG_SLOPE * y)


def ref_forward(x, p):
    dn = ("NCHW", "OIHW", "NCHW")
    y = lax.conv_general_dilated(x, p["w1"], (1, 1), ((1, 1), (1, 1)),
                                 dimension_numbers=dn) + p["b1"][None, :, None, None]
    y = _leaky_ref(_bn_train_ref(y, p["g1"], p["be1"]))
    y = lax.conv_general_dilated(y, p["w2"], (1, 1), ((1, 1), (1, 1)),
                                 dimension_numbers=dn) + p["b2"][None, :, None, None]
    y = _leaky_ref(_bn_train_ref(y, p["g2"], p["be2"]))
    return x + y


if __name__ == "__main__":
    N, C, H, W = 2, 4, 16, 16   # in_channels == out_channels (required by the residual add)

    key = jax.random.PRNGKey(0)
    kx, k1, k2, k3, k4, k5, k6, k7, k8 = jax.random.split(key, 9)

    x = jax.random.normal(kx, (N, C, H, W), dtype=jnp.float32)
    params = {
        "w1":  0.1 * jax.random.normal(k1, (C, C, 3, 3), dtype=jnp.float32),
        "b1":  0.1 * jax.random.normal(k2, (C,), dtype=jnp.float32),
        "g1":  1.0 + 0.1 * jax.random.normal(k3, (C,), dtype=jnp.float32),
        "be1": 0.1 * jax.random.normal(k4, (C,), dtype=jnp.float32),
        "w2":  0.1 * jax.random.normal(k5, (C, C, 3, 3), dtype=jnp.float32),
        "b2":  0.1 * jax.random.normal(k6, (C,), dtype=jnp.float32),
        "g2":  1.0 + 0.1 * jax.random.normal(k7, (C,), dtype=jnp.float32),
        "be2": 0.1 * jax.random.normal(k8, (C,), dtype=jnp.float32),
    }
    # Note: conv biases b1/b2 are intentionally not fed to the kernel — training-mode
    # BatchNorm subtracts the batch mean, so per-channel bias cancels exactly.

    out = jax.jit(gen_residual_block)(x, params)
    out = jax.block_until_ready(out)

    ref = ref_forward(x, params)
    assert out.shape == (N, C, H, W)
    err = float(jnp.max(jnp.abs(out - ref)))
    assert jnp.allclose(out, ref, rtol=1e-4, atol=1e-4), f"max abs err = {err}"

    print("KERNEL_OK")
</pallas_src>

<mosaic_0001>
module attributes {stable_mosaic.version = 11 : i64} {
  func.func @kernel(%arg0: memref<4x512xf32, #tpu.memory_space<vmem>>, %arg1: memref<9x512xf32, #tpu.memory_space<vmem>>, %arg2: memref<9x4x4xf32, #tpu.memory_space<vmem>>, %arg3: memref<4x1xf32, #tpu.memory_space<vmem>>, %arg4: memref<4x1xf32, #tpu.memory_space<vmem>>, %arg5: memref<9x4x4xf32, #tpu.memory_space<vmem>>, %arg6: memref<4x1xf32, #tpu.memory_space<vmem>>, %arg7: memref<4x1xf32, #tpu.memory_space<vmem>>, %arg8: memref<4x512xf32, #tpu.memory_space<vmem>>) attributes {dimension_semantics = [], scalar_prefetch = 0 : i64, scratch_operands = 0 : i64, tpu.core_type = #tpu.core_type<tc>} {
    %c0 = arith.constant 0 : index
    %c0_0 = arith.constant 0 : index
    %0 = vector.load %arg0[%c0, %c0_0] : memref<4x512xf32, #tpu.memory_space<vmem>>, vector<4x512xf32>
    %c0_1 = arith.constant 0 : index
    %c0_2 = arith.constant 0 : index
    %1 = vector.load %arg1[%c0_1, %c0_2] : memref<9x512xf32, #tpu.memory_space<vmem>>, vector<9x512xf32>
    %2 = vector.extract_strided_slice %1 {offsets = [0, 0], sizes = [1, 512], strides = [1, 1]} : vector<9x512xf32> to vector<1x512xf32>
    %3 = vector.extract_strided_slice %1 {offsets = [1, 0], sizes = [1, 512], strides = [1, 1]} : vector<9x512xf32> to vector<1x512xf32>
    %4 = vector.extract_strided_slice %1 {offsets = [2, 0], sizes = [1, 512], strides = [1, 1]} : vector<9x512xf32> to vector<1x512xf32>
    %5 = vector.extract_strided_slice %1 {offsets = [3, 0], sizes = [1, 512], strides = [1, 1]} : vector<9x512xf32> to vector<1x512xf32>
    %6 = vector.extract_strided_slice %1 {offsets = [4, 0], sizes = [1, 512], strides = [1, 1]} : vector<9x512xf32> to vector<1x512xf32>
    %7 = vector.extract_strided_slice %1 {offsets = [5, 0], sizes = [1, 512], strides = [1, 1]} : vector<9x512xf32> to vector<1x512xf32>
    %8 = vector.extract_strided_slice %1 {offsets = [6, 0], sizes = [1, 512], strides = [1, 1]} : vector<9x512xf32> to vector<1x512xf32>
    %9 = vector.extract_strided_slice %1 {offsets = [7, 0], sizes = [1, 512], strides = [1, 1]} : vector<9x512xf32> to vector<1x512xf32>
    %10 = vector.extract_strided_slice %1 {offsets = [8, 0], sizes = [1, 512], strides = [1, 1]} : vector<9x512xf32> to vector<1x512xf32>
    %cst = arith.constant 0.000000e+00 : f32
    %11 = vector.broadcast %cst : f32 to vector<4x512xf32>
    %c17_i32 = arith.constant 17 : i32
    %12 = tpu.dynamic_rotate %0 by %c17_i32 dim 1 : vector<4x512xf32>, i32 -> vector<4x512xf32>
    %13 = vector.broadcast %2 : vector<1x512xf32> to vector<4x512xf32>
    %14 = arith.mulf %12, %13 : vector<4x512xf32>
    %c0_3 = arith.constant 0 : index
    %c0_4 = arith.constant 0 : index
    %c0_5 = arith.constant 0 : index
    %15 = vector.load %arg2[%c0_3, %c0_4, %c0_5] : memref<9x4x4xf32, #tpu.memory_space<vmem>>, vector<1x4x4xf32>
    %16 = vector.shape_cast %15 : vector<1x4x4xf32> to vector<4x4xf32>
    %cst_6 = arith.constant dense<0.000000e+00> : vector<4x512xf32>
    %17 = tpu.matmul %16, %14, %cst_6 {dimension_numbers = #tpu.dot_dimension_numbers<[1], [0], [0], [1], [0, 0, 1, 1], [], []>} : vector<4x4xf32>, vector<4x512xf32>, vector<4x512xf32> -> vector<4x512xf32>
    %18 = arith.addf %11, %17 : vector<4x512xf32>
    %c16_i32 = arith.constant 16 : i32
    %19 = tpu.dynamic_rotate %0 by %c16_i32 dim 1 : vector<4x512xf32>, i32 -> vector<4x512xf32>
    %20 = vector.broadcast %3 : vector<1x512xf32> to vector<4x512xf32>
    %21 = arith.mulf %19, %20 : vector<4x512xf32>
    %c1 = arith.constant 1 : index
    %c0_7 = arith.constant 0 : index
    %c0_8 = arith.constant 0 : index
    %22 = vector.load %arg2[%c1, %c0_7, %c0_8] : memref<9x4x4xf32, #tpu.memory_space<vmem>>, vector<1x4x4xf32>
    %23 = vector.shape_cast %22 : vector<1x4x4xf32> to vector<4x4xf32>
    %cst_9 = arith.constant dense<0.000000e+00> : vector<4x512xf32>
    %24 = tpu.matmul %23, %21, %cst_9 {dimension_numbers = #tpu.dot_dimension_numbers<[1], [0], [0], [1], [0, 0, 1, 1], [], []>} : vector<4x4xf32>, vector<4x512xf32>, vector<4x512xf32> -> vector<4x512xf32>
    %25 = arith.addf %18, %24 : vector<4x512xf32>
    %c15_i32 = arith.constant 15 : i32
    %26 = tpu.dynamic_rotate %0 by %c15_i32 dim 1 : vector<4x512xf32>, i32 -> vector<4x512xf32>
    %27 = vector.broadcast %4 : vector<1x512xf32> to vector<4x512xf32>
    %28 = arith.mulf %26, %27 : vector<4x512xf32>
    %c2 = arith.constant 2 : index
    %c0_10 = arith.constant 0 : index
    %c0_11 = arith.constant 0 : index
    %29 = vector.load %arg2[%c2, %c0_10, %c0_11] : memref<9x4x4xf32, #tpu.memory_space<vmem>>, vector<1x4x4xf32>
    %30 = vector.shape_cast %29 : vector<1x4x4xf32> to vector<4x4xf32>
    %cst_12 = arith.constant dense<0.000000e+00> : vector<4x512xf32>
    %31 = tpu.matmul %30, %28, %cst_12 {dimension_numbers = #tpu.dot_dimension_numbers<[1], [0], [0], [1], [0, 0, 1, 1], [], []>} : vector<4x4xf32>, vector<4x512xf32>, vector<4x512xf32> -> vector<4x512xf32>
    %32 = arith.addf %25, %31 : vector<4x512xf32>
    %c1_i32 = arith.constant 1 : i32
    %33 = tpu.dynamic_rotate %0 by %c1_i32 dim 1 : vector<4x512xf32>, i32 -> vector<4x512xf32>
    %34 = vector.broadcast %5 : vector<1x512xf32> to vector<4x512xf32>
    %35 = arith.mulf %33, %34 : vector<4x512xf32>
    %c3 = arith.constant 3 : index
    %c0_13 = arith.constant 0 : index
    %c0_14 = arith.constant 0 : index
    %36 = vector.load %arg2[%c3, %c0_13, %c0_14] : memref<9x4x4xf32, #tpu.memory_space<vmem>>, vector<1x4x4xf32>
    %37 = vector.shape_cast %36 : vector<1x4x4xf32> to vector<4x4xf32>
    %cst_15 = arith.constant dense<0.000000e+00> : vector<4x512xf32>
    %38 = tpu.matmul %37, %35, %cst_15 {dimension_numbers = #tpu.dot_dimension_numbers<[1], [0], [0], [1], [0, 0, 1, 1], [], []>} : vector<4x4xf32>, vector<4x512xf32>, vector<4x512xf32> -> vector<4x512xf32>
    %39 = arith.addf %32, %38 : vector<4x512xf32>
    %40 = vector.broadcast %6 : vector<1x512xf32> to vector<4x512xf32>
    %41 = arith.mulf %0, %40 : vector<4x512xf32>
    %c4 = arith.constant 4 : index
    %c0_16 = arith.constant 0 : index
    %c0_17 = arith.constant 0 : index
    %42 = vector.load %arg2[%c4, %c0_16, %c0_17] : memref<9x4x4xf32, #tpu.memory_space<vmem>>, vector<1x4x4xf32>
    %43 = vector.shape_cast %42 : vector<1x4x4xf32> to vector<4x4xf32>
    %cst_18 = arith.constant dense<0.000000e+00> : vector<4x512xf32>
    %44 = tpu.matmul %43, %41, %cst_18 {dimension_numbers = #tpu.dot_dimension_numbers<[1], [0], [0], [1], [0, 0, 1, 1], [], []>} : vector<4x4xf32>, vector<4x512xf32>, vector<4x512xf32> -> vector<4x512xf32>
    %45 = arith.addf %39, %44 : vector<4x512xf32>
    %c511_i32 = arith.constant 511 : i32
    %46 = tpu.dynamic_rotate %0 by %c511_i32 dim 1 : vector<4x512xf32>, i32 -> vector<4x512xf32>
    %47 = vector.broadcast %7 : vector<1x512xf32> to vector<4x512xf32>
    %48 = arith.mulf %46, %47 : vector<4x512xf32>
    %c5 = arith.constant 5 : index
    %c0_19 = arith.constant 0 : index
    %c0_20 = arith.constant 0 : index
    %49 = vector.load %arg2[%c5, %c0_19, %c0_20] : memref<9x4x4xf32, #tpu.memory_space<vmem>>, vector<1x4x4xf32>
    %50 = vector.shape_cast %49 : vector<1x4x4xf32> to vector<4x4xf32>
    %cst_21 = arith.constant dense<0.000000e+00> : vector<4x512xf32>
    %51 = tpu.matmul %50, %48, %cst_21 {dimension_numbers = #tpu.dot_dimension_numbers<[1], [0], [0], [1], [0, 0, 1, 1], [], []>} : vector<4x4xf32>, vector<4x512xf32>, vector<4x512xf32> -> vector<4x512xf32>
    %52 = arith.addf %45, %51 : vector<4x512xf32>
    %c497_i32 = arith.constant 497 : i32
    %53 = tpu.dynamic_rotate %0 by %c497_i32 dim 1 : vector<4x512xf32>, i32 -> vector<4x512xf32>
    %54 = vector.broadcast %8 : vector<1x512xf32> to vector<4x512xf32>
    %55 = arith.mulf %53, %54 : vector<4x512xf32>
    %c6 = arith.constant 6 : index
    %c0_22 = arith.constant 0 : index
    %c0_23 = arith.constant 0 : index
    %56 = vector.load %arg2[%c6, %c0_22, %c0_23] : memref<9x4x4xf32, #tpu.memory_space<vmem>>, vector<1x4x4xf32>
    %57 = vector.shape_cast %56 : vector<1x4x4xf32> to vector<4x4xf32>
    %cst_24 = arith.constant dense<0.000000e+00> : vector<4x512xf32>
    %58 = tpu.matmul %57, %55, %cst_24 {dimension_numbers = #tpu.dot_dimension_numbers<[1], [0], [0], [1], [0, 0, 1, 1], [], []>} : vector<4x4xf32>, vector<4x512xf32>, vector<4x512xf32> -> vector<4x512xf32>
    %59 = arith.addf %52, %58 : vector<4x512xf32>
    %c496_i32 = arith.constant 496 : i32
    %60 = tpu.dynamic_rotate %0 by %c496_i32 dim 1 : vector<4x512xf32>, i32 -> vector<4x512xf32>
    %61 = vector.broadcast %9 : vector<1x512xf32> to vector<4x512xf32>
    %62 = arith.mulf %60, %61 : vector<4x512xf32>
    %c7 = arith.constant 7 : index
    %c0_25 = arith.constant 0 : index
    %c0_26 = arith.constant 0 : index
    %63 = vector.load %arg2[%c7, %c0_25, %c0_26] : memref<9x4x4xf32, #tpu.memory_space<vmem>>, vector<1x4x4xf32>
    %64 = vector.shape_cast %63 : vector<1x4x4xf32> to vector<4x4xf32>
    %cst_27 = arith.constant dense<0.000000e+00> : vector<4x512xf32>
    %65 = tpu.matmul %64, %62, %cst_27 {dimension_numbers = #tpu.dot_dimension_numbers<[1], [0], [0], [1], [0, 0, 1, 1], [], []>} : vector<4x4xf32>, vector<4x512xf32>, vector<4x512xf32> -> vector<4x512xf32>
    %66 = arith.addf %59, %65 : vector<4x512xf32>
    %c495_i32 = arith.constant 495 : i32
    %67 = tpu.dynamic_rotate %0 by %c495_i32 dim 1 : vector<4x512xf32>, i32 -> vector<4x512xf32>
    %68 = vector.broadcast %10 : vector<1x512xf32> to vector<4x512xf32>
    %69 = arith.mulf %67, %68 : vector<4x512xf32>
    %c8 = arith.constant 8 : index
    %c0_28 = arith.constant 0 : index
    %c0_29 = arith.constant 0 : index
    %70 = vector.load %arg2[%c8, %c0_28, %c0_29] : memref<9x4x4xf32, #tpu.memory_space<vmem>>, vector<1x4x4xf32>
    %71 = vector.shape_cast %70 : vector<1x4x4xf32> to vector<4x4xf32>
    %cst_30 = arith.constant dense<0.000000e+00> : vector<4x512xf32>
    %72 = tpu.matmul %71, %69, %cst_30 {dimension_numbers = #tpu.dot_dimension_numbers<[1], [0], [0], [1], [0, 0, 1, 1], [], []>} : vector<4x4xf32>, vector<4x512xf32>, vector<4x512xf32> -> vector<4x512xf32>
    %73 = arith.addf %66, %72 : vector<4x512xf32>
    %c0_31 = arith.constant 0 : index
    %c0_32 = arith.constant 0 : index
    %74 = vector.load %arg3[%c0_31, %c0_32] : memref<4x1xf32, #tpu.memory_space<vmem>>, vector<4x1xf32>
    %c0_33 = arith.constant 0 : index
    %c0_34 = arith.constant 0 : index
    %75 = vector.load %arg4[%c0_33, %c0_34] : memref<4x1xf32, #tpu.memory_space<vmem>>, vector<4x1xf32>
    %cst_35 = arith.constant dense<0.000000e+00> : vector<4xf32>
    %76 = vector.multi_reduction <add>, %73, %cst_35 [1] : vector<4x512xf32> to vector<4xf32>
    %77 = vector.shape_cast %76 : vector<4xf32> to vector<4x1xf32>
    %cst_36 = arith.constant 0.001953125 : f32
    %78 = vector.broadcast %cst_36 : f32 to vector<4x1xf32>
    %79 = arith.mulf %77, %78 : vector<4x1xf32>
    %80 = arith.mulf %73, %73 : vector<4x512xf32>
    %cst_37 = arith.constant dense<0.000000e+00> : vector<4xf32>
    %81 = vector.multi_reduction <add>, %80, %cst_37 [1] : vector<4x512xf32> to vector<4xf32>
    %82 = vector.shape_cast %81 : vector<4xf32> to vector<4x1xf32>
    %cst_38 = arith.constant 0.001953125 : f32
    %83 = vector.broadcast %cst_38 : f32 to vector<4x1xf32>
    %84 = arith.mulf %82, %83 : vector<4x1xf32>
    %85 = arith.mulf %79, %79 : vector<4x1xf32>
    %86 = arith.subf %84, %85 : vector<4x1xf32>
    %87 = vector.broadcast %79 : vector<4x1xf32> to vector<4x512xf32>
    %88 = arith.subf %73, %87 : vector<4x512xf32>
    %cst_39 = arith.constant 9.99999974E-6 : f32
    %89 = vector.broadcast %cst_39 : f32 to vector<4x1xf32>
    %90 = arith.addf %86, %89 : vector<4x1xf32>
    %91 = math.rsqrt %90 : vector<4x1xf32>
    %92 = vector.broadcast %91 : vector<4x1xf32> to vector<4x512xf32>
    %93 = arith.mulf %88, %92 : vector<4x512xf32>
    %94 = vector.broadcast %74 : vector<4x1xf32> to vector<4x512xf32>
    %95 = arith.mulf %93, %94 : vector<4x512xf32>
    %96 = vector.broadcast %75 : vector<4x1xf32> to vector<4x512xf32>
    %97 = arith.addf %95, %96 : vector<4x512xf32>
    %cst_40 = arith.constant 0.000000e+00 : f32
    %98 = vector.broadcast %cst_40 : f32 to vector<4x512xf32>
    %99 = arith.cmpf oge, %97, %98 : vector<4x512xf32>
    %cst_41 = arith.constant 2.000000e-01 : f32
    %100 = vector.broadcast %cst_41 : f32 to vector<4x512xf32>
    %101 = arith.mulf %100, %97 : vector<4x512xf32>
    %102 = arith.select %99, %97, %101 : vector<4x512xi1>, vector<4x512xf32>
    %cst_42 = arith.constant 0.000000e+00 : f32
    %103 = vector.broadcast %cst_42 : f32 to vector<4x512xf32>
    %c17_i32_43 = arith.constant 17 : i32
    %104 = tpu.dynamic_rotate %102 by %c17_i32_43 dim 1 : vector<4x512xf32>, i32 -> vector<4x512xf32>
    %105 = vector.broadcast %2 : vector<1x512xf32> to vector<4x512xf32>
    %106 = arith.mulf %104, %105 : vector<4x512xf32>
    %c0_44 = arith.constant 0 : index
    %c0_45 = arith.constant 0 : index
    %c0_46 = arith.constant 0 : index
    %107 = vector.load %arg5[%c0_44, %c0_45, %c0_46] : memref<9x4x4xf32, #tpu.memory_space<vmem>>, vector<1x4x4xf32>
    %108 = vector.shape_cast %107 : vector<1x4x4xf32> to vector<4x4xf32>
    %cst_47 = arith.constant dense<0.000000e+00> : vector<4x512xf32>
    %109 = tpu.matmul %108, %106, %cst_47 {dimension_numbers = #tpu.dot_dimension_numbers<[1], [0], [0], [1], [0, 0, 1, 1], [], []>} : vector<4x4xf32>, vector<4x512xf32>, vector<4x512xf32> -> vector<4x512xf32>
    %110 = arith.addf %103, %109 : vector<4x512xf32>
    %c16_i32_48 = arith.constant 16 : i32
    %111 = tpu.dynamic_rotate %102 by %c16_i32_48 dim 1 : vector<4x512xf32>, i32 -> vector<4x512xf32>
    %112 = vector.broadcast %3 : vector<1x512xf32> to vector<4x512xf32>
    %113 = arith.mulf %111, %112 : vector<4x512xf32>
    %c1_49 = arith.constant 1 : index
    %c0_50 = arith.constant 0 : index
    %c0_51 = arith.constant 0 : index
    %114 = vector.load %arg5[%c1_49, %c0_50, %c0_51] : memref<9x4x4xf32, #tpu.memory_space<vmem>>, vector<1x4x4xf32>
    %115 = vector.shape_cast %114 : vector<1x4x4xf32> to vector<4x4xf32>
    %cst_52 = arith.constant dense<0.000000e+00> : vector<4x512xf32>
    %116 = tpu.matmul %115, %113, %cst_52 {dimension_numbers = #tpu.dot_dimension_numbers<[1], [0], [0], [1], [0, 0, 1, 1], [], []>} : vector<4x4xf32>, vector<4x512xf32>, vector<4x512xf32> -> vector<4x512xf32>
    %117 = arith.addf %110, %116 : vector<4x512xf32>
    %c15_i32_53 = arith.constant 15 : i32
    %118 = tpu.dynamic_rotate %102 by %c15_i32_53 dim 1 : vector<4x512xf32>, i32 -> vector<4x512xf32>
    %119 = vector.broadcast %4 : vector<1x512xf32> to vector<4x512xf32>
    %120 = arith.mulf %118, %119 : vector<4x512xf32>
    %c2_54 = arith.constant 2 : index
    %c0_55 = arith.constant 0 : index
    %c0_56 = arith.constant 0 : index
    %121 = vector.load %arg5[%c2_54, %c0_55, %c0_56] : memref<9x4x4xf32, #tpu.memory_space<vmem>>, vector<1x4x4xf32>
    %122 = vector.shape_cast %121 : vector<1x4x4xf32> to vector<4x4xf32>
    %cst_57 = arith.constant dense<0.000000e+00> : vector<4x512xf32>
    %123 = tpu.matmul %122, %120, %cst_57 {dimension_numbers = #tpu.dot_dimension_numbers<[1], [0], [0], [1], [0, 0, 1, 1], [], []>} : vector<4x4xf32>, vector<4x512xf32>, vector<4x512xf32> -> vector<4x512xf32>
    %124 = arith.addf %117, %123 : vector<4x512xf32>
    %c1_i32_58 = arith.constant 1 : i32
    %125 = tpu.dynamic_rotate %102 by %c1_i32_58 dim 1 : vector<4x512xf32>, i32 -> vector<4x512xf32>
    %126 = vector.broadcast %5 : vector<1x512xf32> to vector<4x512xf32>
    %127 = arith.mulf %125, %126 : vector<4x512xf32>
    %c3_59 = arith.constant 3 : index
    %c0_60 = arith.constant 0 : index
    %c0_61 = arith.constant 0 : index
    %128 = vector.load %arg5[%c3_59, %c0_60, %c0_61] : memref<9x4x4xf32, #tpu.memory_space<vmem>>, vector<1x4x4xf32>
    %129 = vector.shape_cast %128 : vector<1x4x4xf32> to vector<4x4xf32>
    %cst_62 = arith.constant dense<0.000000e+00> : vector<4x512xf32>
    %130 = tpu.matmul %129, %127, %cst_62 {dimension_numbers = #tpu.dot_dimension_numbers<[1], [0], [0], [1], [0, 0, 1, 1], [], []>} : vector<4x4xf32>, vector<4x512xf32>, vector<4x512xf32> -> vector<4x512xf32>
    %131 = arith.addf %124, %130 : vector<4x512xf32>
    %132 = vector.broadcast %6 : vector<1x512xf32> to vector<4x512xf32>
    %133 = arith.mulf %102, %132 : vector<4x512xf32>
    %c4_63 = arith.constant 4 : index
    %c0_64 = arith.constant 0 : index
    %c0_65 = arith.constant 0 : index
    %134 = vector.load %arg5[%c4_63, %c0_64, %c0_65] : memref<9x4x4xf32, #tpu.memory_space<vmem>>, vector<1x4x4xf32>
    %135 = vector.shape_cast %134 : vector<1x4x4xf32> to vector<4x4xf32>
    %cst_66 = arith.constant dense<0.000000e+00> : vector<4x512xf32>
    %136 = tpu.matmul %135, %133, %cst_66 {dimension_numbers = #tpu.dot_dimension_numbers<[1], [0], [0], [1], [0, 0, 1, 1], [], []>} : vector<4x4xf32>, vector<4x512xf32>, vector<4x512xf32> -> vector<4x512xf32>
    %137 = arith.addf %131, %136 : vector<4x512xf32>
    %c511_i32_67 = arith.constant 511 : i32
    %138 = tpu.dynamic_rotate %102 by %c511_i32_67 dim 1 : vector<4x512xf32>, i32 -> vector<4x512xf32>
    %139 = vector.broadcast %7 : vector<1x512xf32> to vector<4x512xf32>
    %140 = arith.mulf %138, %139 : vector<4x512xf32>
    %c5_68 = arith.constant 5 : index
    %c0_69 = arith.constant 0 : index
    %c0_70 = arith.constant 0 : index
    %141 = vector.load %arg5[%c5_68, %c0_69, %c0_70] : memref<9x4x4xf32, #tpu.memory_space<vmem>>, vector<1x4x4xf32>
    %142 = vector.shape_cast %141 : vector<1x4x4xf32> to vector<4x4xf32>
    %cst_71 = arith.constant dense<0.000000e+00> : vector<4x512xf32>
    %143 = tpu.matmul %142, %140, %cst_71 {dimension_numbers = #tpu.dot_dimension_numbers<[1], [0], [0], [1], [0, 0, 1, 1], [], []>} : vector<4x4xf32>, vector<4x512xf32>, vector<4x512xf32> -> vector<4x512xf32>
    %144 = arith.addf %137, %143 : vector<4x512xf32>
    %c497_i32_72 = arith.constant 497 : i32
    %145 = tpu.dynamic_rotate %102 by %c497_i32_72 dim 1 : vector<4x512xf32>, i32 -> vector<4x512xf32>
    %146 = vector.broadcast %8 : vector<1x512xf32> to vector<4x512xf32>
    %147 = arith.mulf %145, %146 : vector<4x512xf32>
    %c6_73 = arith.constant 6 : index
    %c0_74 = arith.constant 0 : index
    %c0_75 = arith.constant 0 : index
    %148 = vector.load %arg5[%c6_73, %c0_74, %c0_75] : memref<9x4x4xf32, #tpu.memory_space<vmem>>, vector<1x4x4xf32>
    %149 = vector.shape_cast %148 : vector<1x4x4xf32> to vector<4x4xf32>
    %cst_76 = arith.constant dense<0.000000e+00> : vector<4x512xf32>
    %150 = tpu.matmul %149, %147, %cst_76 {dimension_numbers = #tpu.dot_dimension_numbers<[1], [0], [0], [1], [0, 0, 1, 1], [], []>} : vector<4x4xf32>, vector<4x512xf32>, vector<4x512xf32> -> vector<4x512xf32>
    %151 = arith.addf %144, %150 : vector<4x512xf32>
    %c496_i32_77 = arith.constant 496 : i32
    %152 = tpu.dynamic_rotate %102 by %c496_i32_77 dim 1 : vector<4x512xf32>, i32 -> vector<4x512xf32>
    %153 = vector.broadcast %9 : vector<1x512xf32> to vector<4x512xf32>
    %154 = arith.mulf %152, %153 : vector<4x512xf32>
    %c7_78 = arith.constant 7 : index
    %c0_79 = arith.constant 0 : index
    %c0_80 = arith.constant 0 : index
    %155 = vector.load %arg5[%c7_78, %c0_79, %c0_80] : memref<9x4x4xf32, #tpu.memory_space<vmem>>, vector<1x4x4xf32>
    %156 = vector.shape_cast %155 : vector<1x4x4xf32> to vector<4x4xf32>
    %cst_81 = arith.constant dense<0.000000e+00> : vector<4x512xf32>
    %157 = tpu.matmul %156, %154, %cst_81 {dimension_numbers = #tpu.dot_dimension_numbers<[1], [0], [0], [1], [0, 0, 1, 1], [], []>} : vector<4x4xf32>, vector<4x512xf32>, vector<4x512xf32> -> vector<4x512xf32>
    %158 = arith.addf %151, %157 : vector<4x512xf32>
    %c495_i32_82 = arith.constant 495 : i32
    %159 = tpu.dynamic_rotate %102 by %c495_i32_82 dim 1 : vector<4x512xf32>, i32 -> vector<4x512xf32>
    %160 = vector.broadcast %10 : vector<1x512xf32> to vector<4x512xf32>
    %161 = arith.mulf %159, %160 : vector<4x512xf32>
    %c8_83 = arith.constant 8 : index
    %c0_84 = arith.constant 0 : index
    %c0_85 = arith.constant 0 : index
    %162 = vector.load %arg5[%c8_83, %c0_84, %c0_85] : memref<9x4x4xf32, #tpu.memory_space<vmem>>, vector<1x4x4xf32>
    %163 = vector.shape_cast %162 : vector<1x4x4xf32> to vector<4x4xf32>
    %cst_86 = arith.constant dense<0.000000e+00> : vector<4x512xf32>
    %164 = tpu.matmul %163, %161, %cst_86 {dimension_numbers = #tpu.dot_dimension_numbers<[1], [0], [0], [1], [0, 0, 1, 1], [], []>} : vector<4x4xf32>, vector<4x512xf32>, vector<4x512xf32> -> vector<4x512xf32>
    %165 = arith.addf %158, %164 : vector<4x512xf32>
    %c0_87 = arith.constant 0 : index
    %c0_88 = arith.constant 0 : index
    %166 = vector.load %arg6[%c0_87, %c0_88] : memref<4x1xf32, #tpu.memory_space<vmem>>, vector<4x1xf32>
    %c0_89 = arith.constant 0 : index
    %c0_90 = arith.constant 0 : index
    %167 = vector.load %arg7[%c0_89, %c0_90] : memref<4x1xf32, #tpu.memory_space<vmem>>, vector<4x1xf32>
    %cst_91 = arith.constant dense<0.000000e+00> : vector<4xf32>
    %168 = vector.multi_reduction <add>, %165, %cst_91 [1] : vector<4x512xf32> to vector<4xf32>
    %169 = vector.shape_cast %168 : vector<4xf32> to vector<4x1xf32>
    %cst_92 = arith.constant 0.001953125 : f32
    %170 = vector.broadcast %cst_92 : f32 to vector<4x1xf32>
    %171 = arith.mulf %169, %170 : vector<4x1xf32>
    %172 = arith.mulf %165, %165 : vector<4x512xf32>
    %cst_93 = arith.constant dense<0.000000e+00> : vector<4xf32>
    %173 = vector.multi_reduction <add>, %172, %cst_93 [1] : vector<4x512xf32> to vector<4xf32>
    %174 = vector.shape_cast %173 : vector<4xf32> to vector<4x1xf32>
    %cst_94 = arith.constant 0.001953125 : f32
    %175 = vector.broadcast %cst_94 : f32 to vector<4x1xf32>
    %176 = arith.mulf %174, %175 : vector<4x1xf32>
    %177 = arith.mulf %171, %171 : vector<4x1xf32>
    %178 = arith.subf %176, %177 : vector<4x1xf32>
    %179 = vector.broadcast %171 : vector<4x1xf32> to vector<4x512xf32>
    %180 = arith.subf %165, %179 : vector<4x512xf32>
    %cst_95 = arith.constant 9.99999974E-6 : f32
    %181 = vector.broadcast %cst_95 : f32 to vector<4x1xf32>
    %182 = arith.addf %178, %181 : vector<4x1xf32>
    %183 = math.rsqrt %182 : vector<4x1xf32>
    %184 = vector.broadcast %183 : vector<4x1xf32> to vector<4x512xf32>
    %185 = arith.mulf %180, %184 : vector<4x512xf32>
    %186 = vector.broadcast %166 : vector<4x1xf32> to vector<4x512xf32>
    %187 = arith.mulf %185, %186 : vector<4x512xf32>
    %188 = vector.broadcast %167 : vector<4x1xf32> to vector<4x512xf32>
    %189 = arith.addf %187, %188 : vector<4x512xf32>
    %cst_96 = arith.constant 0.000000e+00 : f32
    %190 = vector.broadcast %cst_96 : f32 to vector<4x512xf32>
    %191 = arith.cmpf oge, %189, %190 : vector<4x512xf32>
    %cst_97 = arith.constant 2.000000e-01 : f32
    %192 = vector.broadcast %cst_97 : f32 to vector<4x512xf32>
    %193 = arith.mulf %192, %189 : vector<4x512xf32>
    %194 = arith.select %191, %189, %193 : vector<4x512xi1>, vector<4x512xf32>
    %195 = arith.addf %0, %194 : vector<4x512xf32>
    %c0_98 = arith.constant 0 : index
    %c0_99 = arith.constant 0 : index
    %196 = vector.load %arg8[%c0_98, %c0_99] : memref<4x512xf32, #tpu.memory_space<vmem>>, vector<4x512xf32>
    tpu.vector_store %arg8[%c0_98, %c0_99], %195 {strides = array<i32>} : memref<4x512xf32, #tpu.memory_space<vmem>>, vector<4x512xf32>,
    return
  }
}

</mosaic_0001>

<bundles_post_ra>
// kernel: gen_residual_block.1
= control target key start
LH: loop header
LB: loop body
LE: loop exit
PB: predicated region body
PF: predicated region fallthrough
CT: control target
= control target key end

     0   :  { %v3751_v2 = vmov 0.0   ;;  %s3752_s9 = smov 16   ;;  %s3753_s10 = smov 17   ;;  %v53_v5 = vlaneseq  ;;  %vm120_vm1 = vcmask 1043456   ;;  %vm116_vm2 = vcmask 31744   ;;  %s4540_s0 = inlined_call_operand.vmem [shape: f32[4,512], index: 0, kind: input, shape index: {}]   ;;  %s4541_s1 = inlined_call_operand.vmem [shape: f32[9,512], index: 1, kind: input, shape index: {}]   ;;  %s4542_s2 = inlined_call_operand.vmem [shape: f32[9,4,4], index: 2, kind: input, shape index: {}]   ;;  %s4543_s4 = inlined_call_operand.vmem [shape: f32[4,1], index: 4, kind: input, shape index: {}]   ;;  %s4544_s3 = inlined_call_operand.vmem [shape: f32[4,1], index: 3, kind: input, shape index: {}]   ;;  %s4545_s5 = inlined_call_operand.vmem [shape: f32[9,4,4], index: 5, kind: input, shape index: {}]   ;;  %s4546_s7 = inlined_call_operand.vmem [shape: f32[4,1], index: 7, kind: input, shape index: {}]   ;;  %s4547_s6 = inlined_call_operand.vmem [shape: f32[4,1], index: 6, kind: input, shape index: {}]   ;;  %s4548_s8 = inlined_call_operand.vmem [shape: f32[4,512], index: 8, kind: output, shape index: {}]  }
   0x1   :  { %v3809_v0 = vld [vmem:[%s4540_s0] sm:$0xff]  ;;  %v3814_v1 = vld [vmem:[%s4540_s0 + $0x8] sm:$0xff]  ;;  %197 = vmatprep.mubr.f32.mxu0 %v3751_v2  ;;  %268 = vmatprep.mubr.f32.mxu1 %v3751_v2  ;;  %s3754_s11 = smov 15   ;;  %s3755_s12 = smov 1   ;;  %v3889_v12 = vld [vmem:[%s4541_s1 + $0x10] sm:$0xff] }
   0x2   :  { %81 = vrot.lane.b32.xlu0 %v3809_v0, %s3752_s9  ;;  %v42_v3 = vcombine.high %v3814_v1, %v3814_v1  ;;  %v41_v4 = vcombine.high %v3809_v0, %v3809_v0  ;;  %s3756_s13 = smov 127   ;;  %s3757_s14 = smov 113   ;;  %v3870_v6 = vshrl.u32 %v53_v5, 7  ;;  %v3872_v7 = vand.u32 127, %v53_v5  ;;  %v3878_v9 = vld [vmem:[%s4541_s1 + $0x8] sm:$0xff]  ;;  %v3883_v11 = vld [vmem:[%s4541_s1] sm:$0xff] }
   0x3   :  { %s3758_s15 = smov 112   ;;  %s3759_s16 = smov 111   ;;  %v3894_v13 = vld [vmem:[%s4541_s1 + $0x18] sm:$0xff]  ;;  %v3539_v28 = vld [vmem:[%s4542_s2 + $0x4] sm:$0xf] }
   0x4   :  { %87 = vrot.lane.b32.xlu1 %v42_v3, %s3752_s9  ;;  %v96_v8 = vsub.s32 1, %v3870_v6  ;;  %vm89_vm0 = vcmp.lt.s32.totalorder %v3872_v7, 16  ;;  %v62_v21 = vsub.s32 0, %v3870_v6  ;;  %vm55_vm3 = vcmp.lt.s32.totalorder %v3872_v7, 17  ;;  %v80_v47 = vld [vmem:[%s4542_s2] sm:$0xf] }
   0x5   :  { %v447_v40 = vsub.s32 2, %v3870_v6  ;;  %v826_v42 = vsub.s32 4, %v3870_v6  ;;  %vm440_vm4 = vcmp.lt.s32.totalorder %v3872_v7, 15  ;;  %v643_v61 = vsub.s32 3, %v3870_v6 }
   0x6   :  { %83 = vrot.lane.b32.xlu0 %v41_v4, %s3752_s9  ;;  %v3897_v15 = vrot.slane %v3878_v9, %v96_v8  ;;  %v3900_v16 = vrot.slane %v3883_v11, %v96_v8  ;;  %v3905_v19 = vrot.slane %v3889_v12, %v96_v8  ;;  %v3908_v20 = vrot.slane %v3894_v13, %v96_v8 }
   0x7   :  { %v3927_v32 = vrot.slane %v3878_v9, %v62_v21  ;;  %v3933_v34 = vrot.slane %v3883_v11, %v62_v21  ;;  %v3942_v38 = vrot.slane %v3889_v12, %v62_v21  ;;  %v3945_v39 = vrot.slane %v3894_v13, %v62_v21 }
   0x8   :  { %85 = vrot.lane.b32.xlu1 %v3814_v1, %s3752_s9  ;;  %v3966_v51 = vrot.slane %v3878_v9, %v447_v40  ;;  %v3969_v52 = vrot.slane %v3883_v11, %v826_v42  ;;  %v3972_v53 = vrot.slane %v3878_v9, %v826_v42  ;;  %v3977_v55 = vrot.slane %v3883_v11, %v447_v40 }
   0x9   :  { %v3986_v59 = vrot.slane %v3889_v12, %v447_v40  ;;  %v3989_v60 = vrot.slane %v3894_v13, %v447_v40  ;;  %vm636_vm5 = vcmp.lt.s32.totalorder %v3872_v7, 1  ;;  %vm1021_vm6 = vcmp.lt.s32.totalorder %v3872_v7, 127 }
   0xa   :  { %45 = vrot.lane.b32.xlu0 %v3809_v0, %s3753_s10  ;;  %v844_v63 = vcombine.low %v3969_v52, %v3972_v53  ;;  %vm1217_vm7 = vcmp.lt.s32.totalorder %v3872_v7, 113  ;;  %vm1413_vm8 = vcmp.lt.s32.totalorder %v3872_v7, 112  ;;  %vm1609_vm9 = vcmp.lt.s32.totalorder %v3872_v7, 111  ;;  %v3660_v7 = vld [vmem:[%s4545_s5 + $0x20] sm:$0xf] }
   0xc   :  { %47 = vrot.lane.b32.xlu1 %v41_v4, %s3753_s10 }
   0xe   :  { %51 = vrot.lane.b32.xlu0 %v42_v3, %s3753_s10 }
  0x10   :  { %49 = vrot.lane.b32.xlu1 %v3814_v1, %s3753_s10 }
  0x12   :  { %432 = vrot.lane.b32.xlu0 %v3809_v0, %s3754_s11 }
  0x14   :  { %434 = vrot.lane.b32.xlu1 %v41_v4, %s3754_s11 }
  0x16   :  { %438 = vrot.lane.b32.xlu0 %v42_v3, %s3754_s11 }
  0x18   :  { %436 = vrot.lane.b32.xlu1 %v3814_v1, %s3754_s11 }
  0x1a   :  { %628 = vrot.lane.b32.xlu0 %v3809_v0, %s3755_s12 }
  0x1c   :  { %630 = vrot.lane.b32.xlu1 %v41_v4, %s3755_s12 }
  0x1e   :  { %634 = vrot.lane.b32.xlu0 %v42_v3, %s3755_s12 }
  0x20   :  { %632 = vrot.lane.b32.xlu1 %v3814_v1, %s3755_s12 }
  0x22   :  { %1015 = vrot.lane.b32.xlu0 %v41_v4, %s3756_s13 }
  0x24   :  { %1017 = vrot.lane.b32.xlu1 %v3814_v1, %s3756_s13 }
  0x26   :  { %1013 = vrot.lane.b32.xlu0 %v3809_v0, %s3756_s13 }
  0x28   :  { %1019 = vrot.lane.b32.xlu1 %v42_v3, %s3756_s13 }
  0x2a   :  { %1211 = vrot.lane.b32.xlu0 %v41_v4, %s3757_s14 }
  0x2c   :  { %1213 = vrot.lane.b32.xlu1 %v3814_v1, %s3757_s14 }
  0x2e   :  { %1209 = vrot.lane.b32.xlu0 %v3809_v0, %s3757_s14 }
  0x30   :  { %1215 = vrot.lane.b32.xlu1 %v42_v3, %s3757_s14 }
  0x32   :  { %1407 = vrot.lane.b32.xlu0 %v41_v4, %s3758_s15 }
  0x34   :  { %1409 = vrot.lane.b32.xlu1 %v3814_v1, %s3758_s15 }
  0x36   :  { %1405 = vrot.lane.b32.xlu0 %v3809_v0, %s3758_s15 }
  0x38   :  { %1411 = vrot.lane.b32.xlu1 %v42_v3, %s3758_s15 }
  0x3a   :  { %1603 = vrot.lane.b32.xlu0 %v41_v4, %s3759_s16  ;;  %v4001_v4 = vrot.slane %v3894_v13, %v826_v42 }
  0x3c   :  { %1605 = vrot.lane.b32.xlu1 %v3814_v1, %s3759_s16 }
  0x3e   :  { %1601 = vrot.lane.b32.xlu0 %v3809_v0, %s3759_s16 }
  0x40   :  { %1607 = vrot.lane.b32.xlu1 %v42_v3, %s3759_s16  ;;  %v3998_v3 = vrot.slane %v3889_v12, %v826_v42 }
  0x74   :  { %v82_v10 = vpop.permute.xlu0 %81 }
  0x76   :  { %v88_v14 = vpop.permute.xlu1 %87 }
  0x77   :  { %v93_v17 = vsel %vm89_vm0, %v88_v14, %v82_v10 }
  0x78   :  { %v84_v18 = vpop.permute.xlu0 %83  ;;  %v110_v25 = vmul.f32 %v3900_v16, %v93_v17  ;;  %v3552_v17 = vld [vmem:[%s4542_s2 + $0x8] sm:$0xf] }
  0x79   :  { %v92_v22 = vsel %vm89_vm0, %v82_v10, %v84_v18 }
  0x7a   :  { %v86_v23 = vpop.permute.xlu1 %85  ;;  %v111_v24 = vmul.f32 %v3897_v15, %v92_v22 }
  0x7b   :  { %v90_v26 = vsel %vm89_vm0, %v86_v23, %v88_v14  ;;  %v91_v27 = vsel %vm89_vm0, %v84_v18, %v86_v23  ;;  %v4017_v23 = vrot.slane %v3878_v9, %v643_v61 }
  0x7c   :  { %v112_v29 = vmul.f32 %v3905_v19, %v91_v27  ;;  %3540 = vmatprep.subr.msk.mxu0 %vm120_vm1, %v111_v24  ;;  %v46_v30 = vpop.permute.xlu0 %45  ;;  %v113_v31 = vmul.f32 %v3908_v20, %v90_v26  ;;  %v848_v24 = vmul.f32 %v844_v63, %v3809_v0  ;;  %v4025_v27 = vrot.slane %v3883_v11, %v643_v61 }
  0x7d   :  { %3541 = vmatpush1.msk.msra.mxu0 %vm120_vm1, %v110_v25  ;;  %v845_v25 = vcombine.low %v3998_v3, %v4001_v4 }
  0x7e   :  { %3543 = vmatprep.subr.msk.mxu1 %vm120_vm1, %v113_v31  ;;  %v48_v33 = vpop.permute.xlu1 %47  ;;  %3542 = vmatmul.mubr.msk.f32.vlgmr.msra.gmra.mrb[0].mxu0 %vm116_vm2, %v3539_v28  ;;  %v4037_v31 = vrot.slane %v3894_v13, %v643_v61 }
  0x7f   :  { %v58_v35 = vsel %vm55_vm3, %v46_v30, %v48_v33  ;;  %3544 = vmatpush1.msk.msra.mxu1 %vm120_vm1, %v112_v29  ;;  %354 = vmatprep.mubr.f32.mxu0 %v3751_v2 }
  0x80   :  { %v77_v36 = vmul.f32 %v3927_v32, %v58_v35  ;;  %3545 = vmatmul.mubr.msk.f32.vlgmr.msra.gmra.mrb[0].mxu1 %vm116_vm2, %v3539_v28  ;;  %v52_v37 = vpop.permute.xlu0 %51 }
  0x81   :  { %v59_v41 = vsel %vm55_vm3, %v52_v37, %v46_v30  ;;  %425 = vmatprep.mubr.f32.mxu1 %v3751_v2  ;;  %v4034_v30 = vrot.slane %v3889_v12, %v643_v61  ;;  %v1224_v61 = vsub.s32 6, %v3870_v6 }
  0x82   :  { %v76_v43 = vmul.f32 %v3933_v34, %v59_v41  ;;  %v50_v44 = vpop.permute.xlu1 %49  ;;  %3546 = vmatprep.subr.msk.mxu0 %vm120_vm1, %v77_v36  ;;  %v854_v36 = vcombine.high %v848_v24, %v848_v24 }
  0x83   :  { %v56_v45 = vsel %vm55_vm3, %v50_v44, %v52_v37  ;;  %v57_v46 = vsel %vm55_vm3, %v48_v33, %v50_v44  ;;  %v1028_v33 = vsub.s32 5, %v3870_v6  ;;  %v849_v37 = vmul.f32 %v845_v25, %v3814_v1  ;;  %v3559_v44 = vld [vmem:[%s4542_s2 + $0xc] sm:$0xf] }
  0x84   :  { %v78_v48 = vmul.f32 %v3942_v38, %v57_v46  ;;  %v79_v49 = vmul.f32 %v3945_v39, %v56_v45  ;;  %3547 = vmatpush1.msk.msra.mxu0 %vm120_vm1, %v76_v43  ;;  %v433_v50 = vpop.permute.xlu0 %432 }
  0x85   :  { %v4080_v63 = vrot.slane %v3889_v12, %v1028_v33 }
  0x86   :  { %v435_v54 = vpop.permute.xlu1 %434  ;;  %3548 = vmatmul.mubr.msk.f32.vlgmr.msra.gmra.mrb[0].mxu0 %vm116_vm2, %v80_v47  ;;  %3549 = vmatprep.subr.msk.mxu1 %vm120_vm1, %v79_v49 }
  0x87   :  { %v443_v56 = vsel %vm440_vm4, %v433_v50, %v435_v54  ;;  %3550 = vmatpush1.msk.msra.mxu1 %vm120_vm1, %v78_v48  ;;  %546 = vmatprep.mubr.f32.mxu0 %v3751_v2  ;;  %v855_v48 = vcombine.high %v849_v37, %v849_v37 }
  0x88   :  { %v462_v57 = vmul.f32 %v3966_v51, %v443_v56  ;;  %3551 = vmatmul.mubr.msk.f32.vlgmr.msra.gmra.mrb[0].mxu1 %vm116_vm2, %v80_v47  ;;  %v439_v58 = vpop.permute.xlu0 %438  ;;  %v4058_v47 = vrot.slane %v3878_v9, %v1028_v33 }
  0x89   :  { %v444_v62 = vsel %vm440_vm4, %v439_v58, %v433_v50  ;;  %617 = vmatprep.mubr.f32.mxu1 %v3751_v2 }
  0x8a   :  { %v461_v5 = vmul.f32 %v3977_v55, %v444_v62  ;;  %v437_v8 = vpop.permute.xlu1 %436  ;;  %3553 = vmatprep.subr.msk.mxu0 %vm120_vm1, %v462_v57 }
  0x8b   :  { %v441_v10 = vsel %vm440_vm4, %v437_v8, %v439_v58  ;;  %v442_v14 = vsel %vm440_vm4, %v435_v54, %v437_v8  ;;  %v4068_v54 = vrot.slane %v3883_v11, %v1028_v33  ;;  %v4074_v58 = vrot.slane %v3894_v13, %v1028_v33 }
  0x8c   :  { %v463_v18 = vmul.f32 %v3986_v59, %v442_v14  ;;  %v464_v21 = vmul.f32 %v3989_v60, %v441_v10  ;;  %3554 = vmatpush1.msk.msra.mxu0 %vm120_vm1, %v461_v5  ;;  %v629_v22 = vpop.permute.xlu0 %628  ;;  %v4112_v33 = vrot.slane %v3894_v13, %v1224_v61 }
  0x8e   :  { %v631_v26 = vpop.permute.xlu1 %630  ;;  %3555 = vmatmul.mubr.msk.f32.vlgmr.msra.gmra.mrb[0].mxu0 %vm116_vm2, %v3552_v17  ;;  %3556 = vmatprep.subr.msk.mxu1 %vm120_vm1, %v464_v21 }
  0x8f   :  { %v639_v28 = vsel %vm636_vm5, %v629_v22, %v631_v26  ;;  %3557 = vmatpush1.msk.msra.mxu1 %vm120_vm1, %v463_v18  ;;  %742 = vmatprep.mubr.f32.mxu0 %v3751_v2 }
  0x90   :  { %v658_v0 = vmul.f32 %v4017_v23, %v639_v28  ;;  %3558 = vmatmul.mubr.msk.f32.vlgmr.msra.gmra.mrb[0].mxu1 %vm116_vm2, %v3552_v17  ;;  %v635_v29 = vpop.permute.xlu0 %634  ;;  %v3566_v17 = vld [vmem:[%s4542_s2 + $0x10] sm:$0xf]  ;;  %v4107_v28 = vrot.slane %v3883_v11, %v1224_v61 }
  0x91   :  { %v640_v35 = vsel %vm636_vm5, %v635_v29, %v629_v22  ;;  %813 = vmatprep.mubr.f32.mxu1 %v3751_v2  ;;  %v4097_v22 = vrot.slane %v3878_v9, %v1224_v61 }
  0x92   :  { %v657_v40 = vmul.f32 %v4025_v27, %v640_v35  ;;  %v633_v41 = vpop.permute.xlu1 %632  ;;  %3560 = vmatprep.subr.msk.mxu0 %vm120_vm1, %v658_v0  ;;  %v1420_v35 = vsub.s32 7, %v3870_v6 }
  0x93   :  { %v637_v42 = vsel %vm636_vm5, %v633_v41, %v635_v29  ;;  %v638_v43 = vsel %vm636_vm5, %v631_v26, %v633_v41 }
  0x94   :  { %v659_v45 = vmul.f32 %v4034_v30, %v638_v43  ;;  %v660_v46 = vmul.f32 %v4037_v31, %v637_v42  ;;  %3561 = vmatpush1.msk.msra.mxu0 %vm120_vm1, %v657_v40  ;;  %v1016_v1 = vpop.permute.xlu0 %1015  ;;  %v3573_v43 = vld [vmem:[%s4542_s2 + $0x14] sm:$0xf] }
  0x95   :  { %3567 = vmatprep.subr.msk.mxu0 %vm120_vm1, %v854_v36 }
  0x96   :  { %3562 = vmatmul.mubr.msk.f32.vlgmr.msra.gmra.mrb[0].mxu0 %vm116_vm2, %v3559_v44  ;;  %3563 = vmatprep.subr.msk.mxu1 %vm120_vm1, %v660_v46  ;;  %v1018_v49 = vpop.permute.xlu1 %1017  ;;  %v4134_v46 = vrot.slane %v3878_v9, %v1420_v35 }
  0x97   :  { %3564 = vmatpush1.msk.msra.mxu1 %vm120_vm1, %v659_v45  ;;  %v1023_v50 = vsel %vm1021_vm6, %v1016_v1, %v1018_v49  ;;  %3568 = vmatpush1.msk.msra.mxu0 %vm120_vm1, %v848_v24 }
  0x98   :  { %3565 = vmatmul.mubr.msk.f32.vlgmr.msra.gmra.mrb[0].mxu1 %vm116_vm2, %v3559_v44  ;;  %v1043_v56 = vmul.f32 %v4058_v47, %v1023_v50  ;;  %931 = vmatprep.mubr.f32.mxu0 %v3751_v2  ;;  %v1014_v57 = vpop.permute.xlu0 %1013  ;;  %v4144_v50 = vrot.slane %v3883_v11, %v1420_v35 }
  0x99   :  { %v1024_v62 = vsel %vm1021_vm6, %v1014_v57, %v1016_v1  ;;  %3570 = vmatprep.subr.msk.mxu1 %vm120_vm1, %v855_v48  ;;  %1002 = vmatprep.mubr.f32.mxu1 %v3751_v2 }
  0x9a   :  { %v1020_v5 = vpop.permute.xlu1 %1019  ;;  %3571 = vmatpush1.msk.msra.mxu1 %vm120_vm1, %v849_v37  ;;  %3574 = vmatprep.subr.msk.mxu0 %vm120_vm1, %v1043_v56  ;;  %v1042_v8 = vmul.f32 %v4068_v54, %v1024_v62  ;;  %v4119_v37 = vrot.slane %v3889_v12, %v1224_v61  ;;  %v4155_v62 = vrot.slane %v3889_v12, %v1420_v35 }
  0x9b   :  { %v1022_v10 = vsel %vm1021_vm6, %v1018_v49, %v1020_v5  ;;  %v1025_v14 = vsel %vm1021_vm6, %v1020_v5, %v1014_v57  ;;  %v4149_v57 = vrot.slane %v3894_v13, %v1420_v35  ;;  %v4194_v35 = vld [vmem:[%s4541_s1 + $0x38] ss:$0 sm:$0xff] }
  0x9c   :  { %v1045_v18 = vmul.f32 %v4074_v58, %v1025_v14  ;;  %v1212_v21 = vpop.permute.xlu0 %1211  ;;  %v1044_v24 = vmul.f32 %v4080_v63, %v1022_v10  ;;  %v3580_v10 = vld [vmem:[%s4542_s2 + $0x18] sm:$0xf] }
  0x9e   :  { %3569 = vmatmul.mubr.msk.f32.vlgmr.msra.gmra.mrb[0].mxu0 %vm116_vm2, %v3566_v17  ;;  %v1214_v25 = vpop.permute.xlu1 %1213  ;;  %3577 = vmatprep.subr.msk.mxu1 %vm120_vm1, %v1045_v18  ;;  %v4173_v18 = vld [vmem:[%s4541_s1 + $0x28] ss:$0 sm:$0xff] }
  0x9f   :  { %3575 = vmatpush1.msk.msra.mxu0 %vm120_vm1, %v1042_v8  ;;  %v1219_v26 = vsel %vm1217_vm7, %v1212_v21, %v1214_v25  ;;  %1127 = vmatprep.mubr.f32.mxu0 %v3751_v2 }
  0xa0   :  { %3572 = vmatmul.mubr.msk.f32.vlgmr.msra.gmra.mrb[0].mxu1 %vm116_vm2, %v3566_v17  ;;  %v1239_v0 = vmul.f32 %v4097_v22, %v1219_v26  ;;  %v1210_v29 = vpop.permute.xlu0 %1209  ;;  %v4186_v26 = vld [vmem:[%s4541_s1 + $0x20] ss:$0 sm:$0xff] }
  0xa1   :  { %3578 = vmatpush1.msk.msra.mxu1 %vm120_vm1, %v1044_v24  ;;  %v1220_v36 = vsel %vm1217_vm7, %v1210_v29, %v1212_v21  ;;  %1198 = vmatprep.mubr.f32.mxu1 %v3751_v2 }
  0xa2   :  { %v1216_v40 = vpop.permute.xlu1 %1215  ;;  %3581 = vmatprep.subr.msk.mxu0 %vm120_vm1, %v1239_v0  ;;  %v1238_v41 = vmul.f32 %v4107_v28, %v1220_v36  ;;  %v4200_v36 = vld [vmem:[%s4541_s1 + $0x30] ss:$0 sm:$0xff] }
  0xa3   :  { %v1218_v42 = vsel %vm1217_vm7, %v1214_v25, %v1216_v40  ;;  %v1221_v6 = vsel %vm1217_vm7, %v1216_v40, %v1210_v29 }
  0xa4   :  { %v1241_v44 = vmul.f32 %v4112_v33, %v1221_v6  ;;  %v1408_v45 = vpop.permute.xlu0 %1407  ;;  %v1240_v1 = vmul.f32 %v4119_v37, %v1218_v42 }
  0xa6   :  { %3576 = vmatmul.mubr.msk.f32.vlgmr.msra.gmra.mrb[0].mxu0 %vm116_vm2, %v3573_v43  ;;  %v1410_v48 = vpop.permute.xlu1 %1409  ;;  %3584 = vmatprep.subr.msk.mxu1 %vm120_vm1, %v1241_v44 }
  0xa7   :  { %3582 = vmatpush1.msk.msra.mxu0 %vm120_vm1, %v1238_v41  ;;  %v1415_v49 = vsel %vm1413_vm8, %v1408_v45, %v1410_v48  ;;  %1323 = vmatprep.mubr.f32.mxu0 %v3751_v2 }
  0xa8   :  { %3579 = vmatmul.mubr.msk.f32.vlgmr.msra.gmra.mrb[0].mxu1 %vm116_vm2, %v3573_v43  ;;  %v1435_v9 = vmul.f32 %v4134_v46, %v1415_v49  ;;  %v1406_v56 = vpop.permute.xlu0 %1405  ;;  %v3587_v43 = vld [vmem:[%s4542_s2 + $0x1c] sm:$0xf] }
  0xa9   :  { %3585 = vmatpush1.msk.msra.mxu1 %vm120_vm1, %v1240_v1  ;;  %v1416_v61 = vsel %vm1413_vm8, %v1406_v56, %v1408_v45  ;;  %1394 = vmatprep.mubr.f32.mxu1 %v3751_v2  ;;  %v3598_v1 = vld [vmem:[%s4542_s2 + $0x20] sm:$0xf] }
  0xaa   :  { %v1412_v11 = vpop.permute.xlu1 %1411  ;;  %3588 = vmatprep.subr.msk.mxu0 %vm120_vm1, %v1435_v9  ;;  %v1434_v5 = vmul.f32 %v4144_v50, %v1416_v61 }
  0xab   :  { %v1414_v8 = vsel %vm1413_vm8, %v1410_v48, %v1412_v11  ;;  %v1417_v13 = vsel %vm1413_vm8, %v1412_v11, %v1406_v56  ;;  %v3760_v48 = vmov 0  }
  0xac   :  { %v1437_v12 = vmul.f32 %v4149_v57, %v1417_v13  ;;  %v1604_v14 = vpop.permute.xlu0 %1603  ;;  %v1436_v17 = vmul.f32 %v4155_v62, %v1414_v8  ;;  %3741 = vset.pattern.permute.xlu0 %v3760_v48  ;;  %3742 = vset.pattern.permute.xlu1 %v3760_v48 }
  0xae   :  { %3583 = vmatmul.mubr.msk.f32.vlgmr.msra.gmra.mrb[0].mxu0 %vm116_vm2, %v3580_v10  ;;  %v1606_v21 = vpop.permute.xlu1 %1605  ;;  %3591 = vmatprep.subr.msk.mxu1 %vm120_vm1, %v1437_v12 }
  0xaf   :  { %3589 = vmatpush1.msk.msra.mxu0 %vm120_vm1, %v1434_v5  ;;  %v1611_v24 = vsel %vm1609_vm9, %v1604_v14, %v1606_v21  ;;  %1519 = vmatprep.mubr.f32.mxu0 %v3751_v2 }
  0xb0   :  { %3586 = vmatmul.mubr.msk.f32.vlgmr.msra.gmra.mrb[0].mxu1 %vm116_vm2, %v3580_v10  ;;  %v1631_v25 = vmul.f32 %v4173_v18, %v1611_v24  ;;  %v1602_v0 = vpop.permute.xlu0 %1601 }
  0xb1   :  { %3592 = vmatpush1.msk.msra.mxu1 %vm120_vm1, %v1436_v17  ;;  %v1612_v29 = vsel %vm1609_vm9, %v1602_v0, %v1604_v14  ;;  %1590 = vmatprep.mubr.f32.mxu1 %v3751_v2 }
  0xb2   :  { %v1608_v40 = vpop.permute.xlu1 %1607  ;;  %3599 = vmatprep.subr.msk.mxu0 %vm120_vm1, %v1631_v25  ;;  %v1630_v41 = vmul.f32 %v4186_v26, %v1612_v29 }
  0xb3   :  { %v1610_v42 = vsel %vm1609_vm9, %v1606_v21, %v1608_v40  ;;  %v1613_v6 = vsel %vm1609_vm9, %v1608_v40, %v1602_v0 }
  0xb4   :  { %v1633_v44 = vmul.f32 %v4194_v35, %v1613_v6  ;;  %v1632_v45 = vmul.f32 %v4200_v36, %v1610_v42 }
  0xb6   :  { %3590 = vmatmul.mubr.msk.f32.vlgmr.msra.gmra.mrb[0].mxu0 %vm116_vm2, %v3587_v43  ;;  %3602 = vmatprep.subr.msk.mxu1 %vm120_vm1, %v1633_v44  ;;  %v1798_v44 = vld [vmem:[%s4543_s4] sm:$0xf] }
  0xb7   :  { %3600 = vmatpush1.msk.msra.mxu0 %vm120_vm1, %v1630_v41  ;;  %1715 = vmatprep.mubr.f32.mxu0 %v3751_v2 }
  0xb8   :  { %3593 = vmatmul.mubr.msk.f32.vlgmr.msra.gmra.mrb[0].mxu1 %vm116_vm2, %v3587_v43 }
  0xb9   :  { %3603 = vmatpush1.msk.msra.mxu1 %vm120_vm1, %v1632_v45  ;;  %1786 = vmatprep.mubr.f32.mxu1 %v3751_v2  ;;  %v1797_v45 = vld [vmem:[%s4544_s3] sm:$0xf] }
  0xbe   :  { %3601 = vmatmul.mubr.msk.f32.vlgmr.msra.gmra.mrb[0].mxu0 %vm116_vm2, %v3598_v1 }
  0xbf   :  { %1979 = vmatprep.mubr.f32.mxu0 %v3751_v2 }
  0xc0   :  { %3604 = vmatmul.mubr.msk.f32.vlgmr.msra.gmra.mrb[0].mxu1 %vm116_vm2, %v3598_v1 }
  0xc1   :  { %2050 = vmatprep.mubr.f32.mxu1 %v3751_v2 }
 0x191   :  { %v1717_v49 = vpop.f32.mrb[0].mxu0 }
 0x192   :  { %v1799_v9 = vsel %vm120_vm1, %v1717_v49, 0.0  ;;  %v1809_v56 = vmul.f32 %v1717_v49, %v1717_v49  ;;  %v1719_v61 = vpop.f32.mrb[1].mxu0 }
 0x193   :  { %v1800_v11 = vsel %vm120_vm1, %v1719_v61, 0.0  ;;  %v1810_v5 = vmul.f32 %v1719_v61, %v1719_v61  ;;  %v1788_v8 = vpop.f32.mrb[0].mxu1 }
 0x194   :  { %v1813_v13 = vsel %vm120_vm1, %v1809_v56, 0.0  ;;  %v1801_v10 = vadd.f32 %v1800_v11, %v1799_v9  ;;  %v1802_v12 = vsel %vm120_vm1, %v1788_v8, 0.0  ;;  %v1811_v14 = vmul.f32 %v1788_v8, %v1788_v8  ;;  %v1790_v17 = vpop.f32.mrb[1].mxu1 }
 0x195   :  { %v1814_v21 = vsel %vm120_vm1, %v1810_v5, 0.0  ;;  %v1812_v24 = vmul.f32 %v1790_v17, %v1790_v17  ;;  %v1804_v40 = vsel %vm120_vm1, %v1790_v17, 0.0 }
 0x196   :  { %v1803_v25 = vadd.f32 %v1802_v12, %v1801_v10  ;;  %v1815_v0 = vadd.f32 %v1814_v21, %v1813_v13  ;;  %v1816_v29 = vsel %vm120_vm1, %v1811_v14, 0.0 }
 0x197   :  { %v1818_v6 = vsel %vm120_vm1, %v1812_v24, 0.0 }
 0x198   :  { %v1805_v41 = vadd.f32 %v1804_v40, %v1803_v25  ;;  %v1817_v42 = vadd.f32 %v1816_v29, %v1815_v0 }
 0x19a   :  { %1806 = vadd.xlane.f32.xlu0 %v1805_v41  ;;  %v1819_v43 = vadd.f32 %v1818_v6, %v1817_v42 }
 0x19c   :  { %1820 = vadd.xlane.f32.xlu1 %v1819_v43 }
 0x1ad   :  { %1846 = vperm.xlu1 %3742, %v1798_v44  }
 0x1b0   :  { %1837 = vperm.xlu0 %3741, %v1797_v45  }
 0x227   :  { %v1807_v1 = vpop.xlane.xlu0 %1806 }
 0x228   :  { %v1808_v48 = vmul.f32 0.001953125, %v1807_v1 }
 0x229   :  { %v1821_v9 = vpop.xlane.xlu1 %1820 }
 0x22a   :  { %v1822_v56 = vmul.f32 0.001953125, %v1821_v9  ;;  %v1823_v11 = vmul.f32 %v1808_v48, %v1808_v48  ;;  %v1825_v10 = vsub.f32 %v1717_v49, %v1808_v48  ;;  %v1826_v12 = vsub.f32 %v1719_v61, %v1808_v48 }
 0x22b   :  { %v1828_v14 = vsub.f32 %v1790_v17, %v1808_v48  ;;  %v1827_v43 = vsub.f32 %v1788_v8, %v1808_v48 }
 0x22c   :  { %v1824_v5 = vsub.f32 %v1822_v56, %v1823_v11 }
 0x22d   :  { %v1847_v40 = vpop.permute.xlu1 %1846 }
 0x22e   :  { %v1829_v13 = vadd.f32 1e-05, %v1824_v5 }
 0x22f   :  { %v1838_v24 = vpop.permute.xlu0 %1837 }
 0x230   :  { %3745 = vrsqrt.f32 %v1829_v13 }
 0x23a   :  { %v3746_v21 = vpop.eup %3745 }
 0x23b   :  { %v1831_v25 = vmul.f32 %v3746_v21, %v1825_v10  ;;  %v1832_v0 = vmul.f32 %v3746_v21, %v1826_v12  ;;  %v1834_v29 = vmul.f32 %v3746_v21, %v1828_v14  ;;  %v1833_v1 = vmul.f32 %v3746_v21, %v1827_v43 }
 0x23d   :  { %v1840_v41 = vmul.f32 %v1838_v24, %v1831_v25  ;;  %v1841_v42 = vmul.f32 %v1838_v24, %v1832_v0  ;;  %v1843_v6 = vmul.f32 %v1838_v24, %v1834_v29  ;;  %v1842_v61 = vmul.f32 %v1838_v24, %v1833_v1 }
 0x23f   :  { %v1849_v44 = vadd.f32 %v1847_v40, %v1840_v41  ;;  %v1852_v45 = vadd.f32 %v1847_v40, %v1843_v6  ;;  %v1850_v9 = vadd.f32 %v1847_v40, %v1841_v42  ;;  %v1851_v8 = vadd.f32 %v1847_v40, %v1842_v61  ;;  %v3605_v6 = vld [vmem:[%s4545_s5 + $0x4] sm:$0xf] }
 0x241   :  { %vm1853_vm10 = vcmp.ge.f32.partialorder %v1849_v44, 0.0  ;;  %vm1856_vm11 = vcmp.ge.f32.partialorder %v1852_v45, 0.0  ;;  %v1857_v56 = vmul.f32 0.2, %v1849_v44  ;;  %v1860_v49 = vmul.f32 0.2, %v1852_v45 }
 0x242   :  { %v1858_v17 = vmul.f32 0.2, %v1850_v9  ;;  %vm1854_vm12 = vcmp.ge.f32.partialorder %v1850_v9, 0.0  ;;  %v1859_v13 = vmul.f32 0.2, %v1851_v8  ;;  %vm1855_vm13 = vcmp.ge.f32.partialorder %v1851_v8, 0.0 }
 0x243   :  { %v4241_v11 = vsel %vm1853_vm10, %v1849_v44, %v1857_v56  ;;  %v4243_v5 = vsel %vm1856_vm11, %v1852_v45, %v1860_v49 }
 0x244   :  { %1882 = vrot.lane.b32.xlu1 %v4241_v11, %s3752_s9  ;;  %1871 = vrot.lane.b32.xlu0 %v4243_v5, %s3753_s10  ;;  %v4249_v48 = vsel %vm1854_vm12, %v1850_v9, %v1858_v17  ;;  %v4259_v10 = vsel %vm1855_vm13, %v1851_v8, %v1859_v13  ;;  %v1881_v8 = vld [vmem:[%s4545_s5] sm:$0xf] }
 0x248   :  { %1884 = vrot.lane.b32.xlu1 %v4249_v48, %s3752_s9  ;;  %2214 = vrot.lane.b32.xlu0 %v4241_v11, %s3754_s11 }
 0x24c   :  { %1888 = vrot.lane.b32.xlu1 %v4243_v5, %s3752_s9  ;;  %2220 = vrot.lane.b32.xlu0 %v4243_v5, %s3754_s11 }
 0x250   :  { %1886 = vrot.lane.b32.xlu1 %v4259_v10, %s3752_s9  ;;  %2393 = vrot.lane.b32.xlu0 %v4241_v11, %s3755_s12 }
 0x254   :  { %1865 = vrot.lane.b32.xlu1 %v4241_v11, %s3753_s10  ;;  %2399 = vrot.lane.b32.xlu0 %v4243_v5, %s3755_s12 }
 0x258   :  { %1867 = vrot.lane.b32.xlu1 %v4249_v48, %s3753_s10  ;;  %2741 = vrot.lane.b32.xlu0 %v4249_v48, %s3756_s13 }
 0x25c   :  { %1869 = vrot.lane.b32.xlu1 %v4259_v10, %s3753_s10  ;;  %2739 = vrot.lane.b32.xlu0 %v4241_v11, %s3756_s13 }
 0x260   :  { %2216 = vrot.lane.b32.xlu1 %v4249_v48, %s3754_s11  ;;  %2920 = vrot.lane.b32.xlu0 %v4249_v48, %s3757_s14 }
 0x264   :  { %2218 = vrot.lane.b32.xlu1 %v4259_v10, %s3754_s11  ;;  %2918 = vrot.lane.b32.xlu0 %v4241_v11, %s3757_s14 }
 0x268   :  { %2395 = vrot.lane.b32.xlu1 %v4249_v48, %s3755_s12  ;;  %3099 = vrot.lane.b32.xlu0 %v4249_v48, %s3758_s15 }
 0x26c   :  { %2397 = vrot.lane.b32.xlu1 %v4259_v10, %s3755_s12  ;;  %3097 = vrot.lane.b32.xlu0 %v4241_v11, %s3758_s15 }
 0x270   :  { %2743 = vrot.lane.b32.xlu1 %v4259_v10, %s3756_s13  ;;  %3278 = vrot.lane.b32.xlu0 %v4249_v48, %s3759_s16 }
 0x274   :  { %2745 = vrot.lane.b32.xlu1 %v4243_v5, %s3756_s13  ;;  %3276 = vrot.lane.b32.xlu0 %v4241_v11, %s3759_s16 }
 0x278   :  { %2922 = vrot.lane.b32.xlu1 %v4259_v10, %s3757_s14 }
 0x27c   :  { %2924 = vrot.lane.b32.xlu1 %v4243_v5, %s3757_s14 }
 0x280   :  { %3101 = vrot.lane.b32.xlu1 %v4259_v10, %s3758_s15 }
 0x284   :  { %3103 = vrot.lane.b32.xlu1 %v4243_v5, %s3758_s15 }
 0x288   :  { %3280 = vrot.lane.b32.xlu1 %v4259_v10, %s3759_s16 }
 0x28c   :  { %3282 = vrot.lane.b32.xlu1 %v4243_v5, %s3759_s16 }
 0x2b6   :  { %v1883_v12 = vpop.permute.xlu1 %1882  ;;  %v1872_v14 = vpop.permute.xlu0 %1871 }
 0x2ba   :  { %v1885_v21 = vpop.permute.xlu1 %1884  ;;  %v2215_v24 = vpop.permute.xlu0 %2214 }
 0x2bb   :  { %v1892_v25 = vsel %vm89_vm0, %v1883_v12, %v1885_v21 }
 0x2bc   :  { %v1895_v0 = vmul.f32 %v1892_v25, %v3897_v15 }
 0x2be   :  { %3606 = vmatprep.subr.msk.mxu0 %vm120_vm1, %v1895_v0  ;;  %v1889_v29 = vpop.permute.xlu1 %1888  ;;  %v2221_v40 = vpop.permute.xlu0 %2220 }
 0x2bf   :  { %v1893_v41 = vsel %vm89_vm0, %v1889_v29, %v1883_v12  ;;  %v2225_v0 = vsel %vm440_vm4, %v2221_v40, %v2215_v24 }
 0x2c0   :  { %v1894_v42 = vmul.f32 %v1893_v41, %v3900_v16 }
 0x2c2   :  { %3607 = vmatpush1.msk.msra.mxu0 %vm120_vm1, %v1894_v42  ;;  %v1887_v43 = vpop.permute.xlu1 %1886  ;;  %v2394_v44 = vpop.permute.xlu0 %2393  ;;  %v3618_v42 = vld [vmem:[%s4545_s5 + $0x8] sm:$0xf] }
 0x2c3   :  { %v1890_v15 = vsel %vm89_vm0, %v1887_v43, %v1889_v29  ;;  %v1891_v45 = vsel %vm89_vm0, %v1885_v21, %v1887_v43  ;;  %3608 = vmatmul.mubr.msk.f32.vlgmr.msra.gmra.mrb[2].mxu0 %vm116_vm2, %v3605_v6 }
 0x2c4   :  { %v1896_v1 = vmul.f32 %v1891_v45, %v3905_v19  ;;  %v1897_v16 = vmul.f32 %v1890_v15, %v3908_v20  ;;  %2136 = vmatprep.mubr.f32.mxu0 %v3751_v2 }
 0x2c6   :  { %3609 = vmatprep.subr.msk.mxu1 %vm120_vm1, %v1897_v16  ;;  %v1866_v9 = vpop.permute.xlu1 %1865  ;;  %v2400_v56 = vpop.permute.xlu0 %2399  ;;  %v3625_v16 = vld [vmem:[%s4545_s5 + $0xc] sm:$0xf] }
 0x2c7   :  { %3610 = vmatpush1.msk.msra.mxu1 %vm120_vm1, %v1896_v1  ;;  %v1876_v49 = vsel %vm55_vm3, %v1872_v14, %v1866_v9  ;;  %v2404_v15 = vsel %vm636_vm5, %v2400_v56, %v2394_v44 }
 0x2c8   :  { %3611 = vmatmul.mubr.msk.f32.vlgmr.msra.gmra.mrb[2].mxu1 %vm116_vm2, %v3605_v6  ;;  %v1877_v17 = vmul.f32 %v1876_v49, %v3933_v34 }
 0x2c9   :  { %2207 = vmatprep.mubr.f32.mxu1 %v3751_v2 }
 0x2ca   :  { %v1868_v61 = vpop.permute.xlu1 %1867  ;;  %v2742_v12 = vpop.permute.xlu0 %2741 }
 0x2cb   :  { %v1875_v19 = vsel %vm55_vm3, %v1866_v9, %v1868_v61 }
 0x2cc   :  { %v1878_v20 = vmul.f32 %v1875_v19, %v3927_v32 }
 0x2ce   :  { %3612 = vmatprep.subr.msk.mxu0 %vm120_vm1, %v1878_v20  ;;  %v1870_v13 = vpop.permute.xlu1 %1869 }
 0x2cf   :  { %v1873_v21 = vsel %vm55_vm3, %v1870_v13, %v1872_v14  ;;  %v1874_v25 = vsel %vm55_vm3, %v1868_v61, %v1870_v13  ;;  %3613 = vmatpush1.msk.msra.mxu0 %vm120_vm1, %v1877_v17 }
 0x2d0   :  { %v1879_v32 = vmul.f32 %v1874_v25, %v3942_v38  ;;  %v1880_v34 = vmul.f32 %v1873_v21, %v3945_v39  ;;  %3614 = vmatmul.mubr.msk.f32.vlgmr.msra.gmra.mrb[2].mxu0 %vm116_vm2, %v1881_v8  ;;  %v2226_v38 = vmul.f32 %v2225_v0, %v3977_v55  ;;  %v2740_v39 = vpop.permute.xlu0 %2739  ;;  %v3639_v25 = vld [vmem:[%s4545_s5 + $0x14] sm:$0xf] }
 0x2d1   :  { %2311 = vmatprep.mubr.f32.mxu0 %v3751_v2 }
 0x2d2   :  { %3615 = vmatprep.subr.msk.mxu1 %vm120_vm1, %v1880_v34  ;;  %v2217_v29 = vpop.permute.xlu1 %2216 }
 0x2d3   :  { %v2224_v14 = vsel %vm440_vm4, %v2215_v24, %v2217_v29  ;;  %3616 = vmatpush1.msk.msra.mxu1 %vm120_vm1, %v1879_v32 }
 0x2d4   :  { %v2227_v41 = vmul.f32 %v2224_v14, %v3966_v51  ;;  %3617 = vmatmul.mubr.msk.f32.vlgmr.msra.gmra.mrb[2].mxu1 %vm116_vm2, %v1881_v8 }
 0x2d5   :  { %2382 = vmatprep.mubr.f32.mxu1 %v3751_v2 }
 0x2d6   :  { %3619 = vmatprep.subr.msk.mxu0 %vm120_vm1, %v2227_v41  ;;  %v2219_v6 = vpop.permute.xlu1 %2218 }
 0x2d7   :  { %v2222_v24 = vsel %vm440_vm4, %v2219_v6, %v2221_v40  ;;  %v2223_v51 = vsel %vm440_vm4, %v2217_v29, %v2219_v6  ;;  %3620 = vmatpush1.msk.msra.mxu0 %vm120_vm1, %v2226_v38  ;;  %v2921_v40 = vpop.permute.xlu0 %2920 }
 0x2d8   :  { %v2228_v55 = vmul.f32 %v2223_v51, %v3986_v59  ;;  %v2229_v43 = vmul.f32 %v2222_v24, %v3989_v60  ;;  %3621 = vmatmul.mubr.msk.f32.vlgmr.msra.gmra.mrb[2].mxu0 %vm116_vm2, %v3618_v42  ;;  %v2405_v60 = vmul.f32 %v2404_v15, %v4025_v27  ;;  %v2572_v27 = vmul.f32 %v4241_v11, %v3969_v52 }
 0x2d9   :  { %2490 = vmatprep.mubr.f32.mxu0 %v3751_v2 }
 0x2da   :  { %3622 = vmatprep.subr.msk.mxu1 %vm120_vm1, %v2229_v43  ;;  %v2396_v45 = vpop.permute.xlu1 %2395 }
 0x2db   :  { %v2403_v1 = vsel %vm636_vm5, %v2394_v44, %v2396_v45  ;;  %3623 = vmatpush1.msk.msra.mxu1 %vm120_vm1, %v2228_v55  ;;  %v2573_v44 = vmul.f32 %v4249_v48, %v3972_v53  ;;  %v2919_v53 = vpop.permute.xlu0 %2918 }
 0x2dc   :  { %v2406_v59 = vmul.f32 %v2403_v1, %v4017_v23  ;;  %3624 = vmatmul.mubr.msk.f32.vlgmr.msra.gmra.mrb[2].mxu1 %vm116_vm2, %v3618_v42 }
 0x2dd   :  { %2561 = vmatprep.mubr.f32.mxu1 %v3751_v2 }
 0x2de   :  { %3626 = vmatprep.subr.msk.mxu0 %vm120_vm1, %v2406_v59  ;;  %v2398_v9 = vpop.permute.xlu1 %2397 }
 0x2df   :  { %v2401_v49 = vsel %vm636_vm5, %v2398_v9, %v2400_v56  ;;  %v2402_v23 = vsel %vm636_vm5, %v2396_v45, %v2398_v9  ;;  %3627 = vmatpush1.msk.msra.mxu0 %vm120_vm1, %v2405_v60  ;;  %v2575_v56 = vmul.f32 %v4243_v5, %v4001_v4  ;;  %v3632_v4 = vld [vmem:[%s4545_s5 + $0x10] sm:$0xf]  ;;  %v3653_v45 = vld [vmem:[%s4545_s5 + $0x1c] sm:$0xf] }
 0x2e0   :  { %v2407_v61 = vmul.f32 %v2402_v23, %v4034_v30  ;;  %v2408_v19 = vmul.f32 %v2401_v49, %v4037_v31  ;;  %3628 = vmatmul.mubr.msk.f32.vlgmr.msra.gmra.mrb[2].mxu0 %vm116_vm2, %v3625_v16  ;;  %3633 = vmatprep.subr.msk.mxu0 %vm120_vm1, %v2573_v44  ;;  %v2574_v30 = vmul.f32 %v4259_v10, %v3998_v3  ;;  %v3100_v10 = vpop.permute.xlu0 %3099 }
 0x2e1   :  { %3634 = vmatpush1.msk.msra.mxu0 %vm120_vm1, %v2572_v27  ;;  %2657 = vmatprep.mubr.f32.mxu0 %v3751_v2  ;;  %v2749_v31 = vsel %vm1021_vm6, %v2740_v39, %v2742_v12 }
 0x2e2   :  { %3629 = vmatprep.subr.msk.mxu1 %vm120_vm1, %v2408_v19  ;;  %v2744_v48 = vpop.permute.xlu1 %2743  ;;  %v2751_v3 = vmul.f32 %v2749_v31, %v4068_v54 }
 0x2e3   :  { %v2748_v52 = vsel %vm1021_vm6, %v2742_v12, %v2744_v48  ;;  %3630 = vmatpush1.msk.msra.mxu1 %vm120_vm1, %v2407_v61  ;;  %v2928_v12 = vsel %vm1217_vm7, %v2919_v53, %v2921_v40 }
 0x2e4   :  { %v2752_v11 = vmul.f32 %v2748_v52, %v4058_v47  ;;  %3631 = vmatmul.mubr.msk.f32.vlgmr.msra.gmra.mrb[2].mxu1 %vm116_vm2, %v3625_v16  ;;  %3636 = vmatprep.subr.msk.mxu1 %vm120_vm1, %v2575_v56  ;;  %v2930_v32 = vmul.f32 %v2928_v12, %v4107_v28 }
 0x2e5   :  { %3637 = vmatpush1.msk.msra.mxu1 %vm120_vm1, %v2574_v30  ;;  %2728 = vmatprep.mubr.f32.mxu1 %v3751_v2 }
 0x2e6   :  { %v2746_v5 = vpop.permute.xlu1 %2745  ;;  %3640 = vmatprep.subr.msk.mxu0 %vm120_vm1, %v2752_v11 }
 0x2e7   :  { %v2750_v47 = vsel %vm1021_vm6, %v2746_v5, %v2740_v39  ;;  %v2747_v20 = vsel %vm1021_vm6, %v2744_v48, %v2746_v5  ;;  %v3646_v39 = vld [vmem:[%s4545_s5 + $0x18] sm:$0xf] }
 0x2e8   :  { %v2754_v17 = vmul.f32 %v2750_v47, %v4074_v58  ;;  %3635 = vmatmul.mubr.msk.f32.vlgmr.msra.gmra.mrb[2].mxu0 %vm116_vm2, %v3632_v4  ;;  %v2753_v54 = vmul.f32 %v2747_v20, %v4080_v63  ;;  %v3098_v58 = vpop.permute.xlu0 %3097  ;;  %v3455_v47 = vld [vmem:[%s4547_s6] sm:$0xf] }
 0x2e9   :  { %3641 = vmatpush1.msk.msra.mxu0 %vm120_vm1, %v2751_v3  ;;  %2836 = vmatprep.mubr.f32.mxu0 %v3751_v2  ;;  %v3107_v38 = vsel %vm1413_vm8, %v3098_v58, %v3100_v10 }
 0x2ea   :  { %3643 = vmatprep.subr.msk.mxu1 %vm120_vm1, %v2754_v17  ;;  %v2923_v8 = vpop.permute.xlu1 %2922 }
 0x2eb   :  { %v2927_v13 = vsel %vm1217_vm7, %v2921_v40, %v2923_v8 }
 0x2ec   :  { %v2931_v21 = vmul.f32 %v2927_v13, %v4097_v22  ;;  %3638 = vmatmul.mubr.msk.f32.vlgmr.msra.gmra.mrb[2].mxu1 %vm116_vm2, %v3632_v4  ;;  %v3279_v14 = vpop.permute.xlu0 %3278 }
 0x2ed   :  { %3644 = vmatpush1.msk.msra.mxu1 %vm120_vm1, %v2753_v54  ;;  %2907 = vmatprep.mubr.f32.mxu1 %v3751_v2 }
 0x2ee   :  { %v2925_v63 = vpop.permute.xlu1 %2924  ;;  %3647 = vmatprep.subr.msk.mxu0 %vm120_vm1, %v2931_v21 }
 0x2ef   :  { %v2929_v34 = vsel %vm1217_vm7, %v2925_v63, %v2919_v53  ;;  %v2926_v22 = vsel %vm1217_vm7, %v2923_v8, %v2925_v63 }
 0x2f0   :  { %v2933_v0 = vmul.f32 %v2929_v34, %v4112_v33  ;;  %3642 = vmatmul.mubr.msk.f32.vlgmr.msra.gmra.mrb[2].mxu0 %vm116_vm2, %v3639_v25  ;;  %v2932_v28 = vmul.f32 %v2926_v22, %v4119_v37  ;;  %v3109_v37 = vmul.f32 %v3107_v38, %v4144_v50  ;;  %v3277_v51 = vpop.permute.xlu0 %3276 }
 0x2f1   :  { %3648 = vmatpush1.msk.msra.mxu0 %vm120_vm1, %v2930_v32  ;;  %3015 = vmatprep.mubr.f32.mxu0 %v3751_v2  ;;  %v3286_v15 = vsel %vm1609_vm9, %v3277_v51, %v3279_v14 }
 0x2f2   :  { %3650 = vmatprep.subr.msk.mxu1 %vm120_vm1, %v2933_v0  ;;  %v3102_v29 = vpop.permute.xlu1 %3101 }
 0x2f3   :  { %v3106_v41 = vsel %vm1413_vm8, %v3100_v10, %v3102_v29  ;;  %v3456_v10 = vld [vmem:[%s4546_s7] sm:$0xf] }
 0x2f4   :  { %v3110_v33 = vmul.f32 %v3106_v41, %v4134_v46  ;;  %3645 = vmatmul.mubr.msk.f32.vlgmr.msra.gmra.mrb[2].mxu1 %vm116_vm2, %v3639_v25 }
 0x2f5   :  { %3651 = vmatpush1.msk.msra.mxu1 %vm120_vm1, %v2932_v28  ;;  %3086 = vmatprep.mubr.f32.mxu1 %v3751_v2 }
 0x2f6   :  { %v3104_v42 = vpop.permute.xlu1 %3103  ;;  %3654 = vmatprep.subr.msk.mxu0 %vm120_vm1, %v3110_v33 }
 0x2f7   :  { %v3108_v6 = vsel %vm1413_vm8, %v3104_v42, %v3098_v58  ;;  %v3105_v46 = vsel %vm1413_vm8, %v3102_v29, %v3104_v42 }
 0x2f8   :  { %v3112_v24 = vmul.f32 %v3108_v6, %v4149_v57  ;;  %3649 = vmatmul.mubr.msk.f32.vlgmr.msra.gmra.mrb[2].mxu0 %vm116_vm2, %v3646_v39  ;;  %v3111_v50 = vmul.f32 %v3105_v46, %v4155_v62  ;;  %v3288_v62 = vmul.f32 %v4186_v26, %v3286_v15 }
 0x2f9   :  { %3655 = vmatpush1.msk.msra.mxu0 %vm120_vm1, %v3109_v37  ;;  %3194 = vmatprep.mubr.f32.mxu0 %v3751_v2 }
 0x2fa   :  { %3657 = vmatprep.subr.msk.mxu1 %vm120_vm1, %v3112_v24  ;;  %v3281_v55 = vpop.permute.xlu1 %3280 }
 0x2fb   :  { %v3285_v43 = vsel %vm1609_vm9, %v3279_v14, %v3281_v55 }
 0x2fc   :  { %v3289_v57 = vmul.f32 %v4173_v18, %v3285_v43  ;;  %3652 = vmatmul.mubr.msk.f32.vlgmr.msra.gmra.mrb[2].mxu1 %vm116_vm2, %v3646_v39 }
 0x2fd   :  { %3658 = vmatpush1.msk.msra.mxu1 %vm120_vm1, %v3111_v50  ;;  %3265 = vmatprep.mubr.f32.mxu1 %v3751_v2 }
 0x2fe   :  { %v3283_v40 = vpop.permute.xlu1 %3282  ;;  %3661 = vmatprep.subr.msk.mxu0 %vm120_vm1, %v3289_v57 }
 0x2ff   :  { %v3287_v1 = vsel %vm1609_vm9, %v3283_v40, %v3277_v51  ;;  %v3284_v18 = vsel %vm1609_vm9, %v3281_v55, %v3283_v40 }
 0x300   :  { %v3291_v59 = vmul.f32 %v4194_v35, %v3287_v1  ;;  %3656 = vmatmul.mubr.msk.f32.vlgmr.msra.gmra.mrb[2].mxu0 %vm116_vm2, %v3653_v45  ;;  %v3290_v60 = vmul.f32 %v4200_v36, %v3284_v18  ;;  %v3749_v18 = vld [vmem:[%s4540_s0] sm:$0xff] }
 0x301   :  { %3662 = vmatpush1.msk.msra.mxu0 %vm120_vm1, %v3288_v62  ;;  %3373 = vmatprep.mubr.f32.mxu0 %v3751_v2 }
 0x302   :  { %3664 = vmatprep.subr.msk.mxu1 %vm120_vm1, %v3291_v59 }
 0x304   :  { %3659 = vmatmul.mubr.msk.f32.vlgmr.msra.gmra.mrb[2].mxu1 %vm116_vm2, %v3653_v45 }
 0x305   :  { %3665 = vmatpush1.msk.msra.mxu1 %vm120_vm1, %v3290_v60  ;;  %3444 = vmatprep.mubr.f32.mxu1 %v3751_v2  ;;  %v3750_v60 = vld [vmem:[%s4540_s0 + $0x8] sm:$0xff] }
 0x308   :  { %3663 = vmatmul.mubr.msk.f32.vlgmr.msra.gmra.mrb[2].mxu0 %vm116_vm2, %v3660_v7 }
 0x30c   :  { %3666 = vmatmul.mubr.msk.f32.vlgmr.msra.gmra.mrb[2].mxu1 %vm116_vm2, %v3660_v7 }
 0x3db   :  { %v3375_v26 = vpop.f32.mrb[2].mxu0 }
 0x3dc   :  { %v3457_v35 = vsel %vm120_vm1, %v3375_v26, 0.0  ;;  %v3467_v16 = vmul.f32 %v3375_v26, %v3375_v26  ;;  %v3377_v9 = vpop.f32.mrb[3].mxu0 }
 0x3dd   :  { %v3458_v36 = vsel %vm120_vm1, %v3377_v9, 0.0  ;;  %v3468_v44 = vmul.f32 %v3377_v9, %v3377_v9 }
 0x3de   :  { %v3471_v49 = vsel %vm120_vm1, %v3467_v16, 0.0  ;;  %v3459_v23 = vadd.f32 %v3458_v36, %v3457_v35 }
 0x3df   :  { %v3472_v27 = vsel %vm120_vm1, %v3468_v44, 0.0  ;;  %v3446_v61 = vpop.f32.mrb[2].mxu1 }
 0x3e0   :  { %v3473_v19 = vadd.f32 %v3472_v27, %v3471_v49  ;;  %v3460_v2 = vsel %vm120_vm1, %v3446_v61, 0.0  ;;  %v3469_v53 = vmul.f32 %v3446_v61, %v3446_v61  ;;  %v3448_v48 = vpop.f32.mrb[3].mxu1 }
 0x3e1   :  { %v3462_v56 = vsel %vm120_vm1, %v3448_v48, 0.0  ;;  %v3470_v52 = vmul.f32 %v3448_v48, %v3448_v48  ;;  %v3461_v30 = vadd.f32 %v3460_v2, %v3459_v23 }
 0x3e2   :  { %v3474_v31 = vsel %vm120_vm1, %v3469_v53, 0.0 }
 0x3e3   :  { %v3463_v11 = vadd.f32 %v3462_v56, %v3461_v30  ;;  %v3475_v4 = vadd.f32 %v3474_v31, %v3473_v19  ;;  %v3476_v5 = vsel %vm120_vm1, %v3470_v52, 0.0 }
 0x3e5   :  { %3464 = vadd.xlane.f32.xlu0 %v3463_v11  ;;  %v3477_v3 = vadd.f32 %v3476_v5, %v3475_v4 }
 0x3e7   :  { %3478 = vadd.xlane.f32.xlu1 %v3477_v3 }
 0x3f8   :  { %3504 = vperm.xlu1 %3742, %v3456_v10  }
 0x3fb   :  { %3495 = vperm.xlu0 %3741, %v3455_v47  }
 0x472   :  { %v3465_v20 = vpop.xlane.xlu0 %3464 }
 0x473   :  { %v3466_v17 = vmul.f32 0.001953125, %v3465_v20 }
 0x474   :  { %v3479_v8 = vpop.xlane.xlu1 %3478 }
 0x475   :  { %v3480_v54 = vmul.f32 0.001953125, %v3479_v8  ;;  %v3481_v13 = vmul.f32 %v3466_v17, %v3466_v17  ;;  %v3483_v58 = vsub.f32 %v3375_v26, %v3466_v17  ;;  %v3484_v25 = vsub.f32 %v3377_v9, %v3466_v17 }
 0x476   :  { %v3485_v63 = vsub.f32 %v3446_v61, %v3466_v17  ;;  %v3486_v32 = vsub.f32 %v3448_v48, %v3466_v17 }
 0x477   :  { %v3482_v12 = vsub.f32 %v3480_v54, %v3481_v13 }
 0x478   :  { %v3505_v42 = vpop.permute.xlu1 %3504 }
 0x479   :  { %v3487_v21 = vadd.f32 1e-05, %v3482_v12 }
 0x47a   :  { %v3496_v28 = vpop.permute.xlu0 %3495 }
 0x47b   :  { %3747 = vrsqrt.f32 %v3487_v21 }
 0x485   :  { %v3748_v34 = vpop.eup %3747 }
 0x486   :  { %v3489_v22 = vmul.f32 %v3748_v34, %v3483_v58  ;;  %v3490_v0 = vmul.f32 %v3748_v34, %v3484_v25  ;;  %v3491_v29 = vmul.f32 %v3748_v34, %v3485_v63  ;;  %v3492_v14 = vmul.f32 %v3748_v34, %v3486_v32 }
 0x488   :  { %v3498_v41 = vmul.f32 %v3496_v28, %v3489_v22  ;;  %v3499_v38 = vmul.f32 %v3496_v28, %v3490_v0  ;;  %v3500_v33 = vmul.f32 %v3496_v28, %v3491_v29  ;;  %v3501_v39 = vmul.f32 %v3496_v28, %v3492_v14 }
 0x48a   :  { %v3507_v37 = vadd.f32 %v3505_v42, %v3498_v41  ;;  %v3508_v6 = vadd.f32 %v3505_v42, %v3499_v38  ;;  %v3509_v46 = vadd.f32 %v3505_v42, %v3500_v33  ;;  %v3510_v24 = vadd.f32 %v3505_v42, %v3501_v39 }
 0x48c   :  { %vm3511_vm14 = vcmp.ge.f32.partialorder %v3507_v37, 0.0  ;;  %vm3512_vm15 = vcmp.ge.f32.partialorder %v3508_v6, 0.0  ;;  %vm3513_vm0 = vcmp.ge.f32.partialorder %v3509_v46, 0.0  ;;  %vm3514_vm1 = vcmp.ge.f32.partialorder %v3510_v24, 0.0 }
 0x48d   :  { %v3515_v51 = vmul.f32 0.2, %v3507_v37  ;;  %v3516_v55 = vmul.f32 0.2, %v3508_v6  ;;  %v3517_v50 = vmul.f32 0.2, %v3509_v46 }
 0x48e   :  { %v3518_v43 = vmul.f32 0.2, %v3510_v24 }
 0x48f   :  { %v3519_v15 = vsel %vm3511_vm14, %v3507_v37, %v3515_v51  ;;  %v3520_v57 = vsel %vm3512_vm15, %v3508_v6, %v3516_v55  ;;  %v3521_v45 = vsel %vm3513_vm0, %v3509_v46, %v3517_v50 }
 0x490   :  { %v3522_v40 = vsel %vm3514_vm1, %v3510_v24, %v3518_v43  ;;  %v3527_v62 = vcombine.low %v3519_v15, %v3520_v57 }
 0x491   :  { %v3528_v1 = vcombine.low %v3521_v45, %v3522_v40 }
 0x492   :  { %v3531_v59 = vadd.f32 %v3749_v18, %v3527_v62 }
 0x493   :  { %v3532_v7 = vadd.f32 %v3750_v60, %v3528_v1 }
 0x494   :  { %3533 = vst [vmem:[%s4548_s8] sm:$0xff] %v3531_v59 }
 0x495   :  { %3534 = vst [vmem:[%s4548_s8 + $0x8] sm:$0xff] %v3532_v7 }

</bundles_post_ra>
